<compile_context>
chip_gen: v7x
topology: tpu7x:2x2x1
jax: 0.10.0
libtpu: 0.0.40
codegen_flags: <defaults>
</compile_context>

<pallas_src>
import functools

import jax
import jax.numpy as jnp
from jax import lax
from jax.experimental import pallas as pl
from jax.experimental.pallas import tpu as pltpu


def _round_up(x, m):
    return (x + m - 1) // m * m


# --------------------------------------------------------------------------------------
# Phase 1: hoisted input projection  gi_g = X @ W_ih_g^T + b_g   (one big matmul per gate)
# --------------------------------------------------------------------------------------
def input_proj_kernel(x_ref, wih_ref, bgi_ref, gr_ref, gz_ref, gn_ref):
    """x_ref: (RB, E) time-major flattened rows; wih_ref: (3, E, H); bgi_ref: (3, 1, H)
    with biases pre-folded ([b_ir+b_hr, b_iz+b_hz, b_in]); g*_ref: (RB, H) per gate."""
    x = x_ref[...]
    for g, o_ref in enumerate((gr_ref, gz_ref, gn_ref)):
        o_ref[...] = (jnp.dot(x, wih_ref[g], preferred_element_type=jnp.float32)
                      + bgi_ref[g]).astype(o_ref.dtype)


# --------------------------------------------------------------------------------------
# Phase 2: serial GRU recurrence over TBLK timesteps per grid step
# --------------------------------------------------------------------------------------
def gru_recurrence_kernel(gr_ref, gz_ref, gn_ref, whh_ref, bhn_ref,
                          h_out_ref, h_acc, *, tblk, seq_len, masked):
    """gr/gz/gn_ref: (TBLK, B, H) precomputed input projections for this time-block.
    whh_ref: (3, H, H) gate-major W_hh^T; bhn_ref: (1, H) hidden bias of the n-gate.
    h_out_ref: (B, H) final hidden state; h_acc: (B, H) VMEM state carried across grid."""
    tb = pl.program_id(0)

    @pl.when(tb == 0)
    def _():
        h_acc[...] = jnp.zeros_like(h_acc)

    # Hoisted out of the serial loop: weight loads and the bias broadcast.
    w_r = whh_ref[0]
    w_z = whh_ref[1]
    w_n = whh_ref[2]
    b_n = jnp.broadcast_to(bhn_ref[...], h_acc.shape)
    t0 = tb * tblk

    def step(t, h):
        gh_r = jnp.dot(h, w_r, preferred_element_type=jnp.float32)
        gh_z = jnp.dot(h, w_z, preferred_element_type=jnp.float32)
        gh_n = jnp.dot(h, w_n, preferred_element_type=jnp.float32) + b_n
        r = jax.nn.sigmoid(gr_ref[t] + gh_r)
        z = jax.nn.sigmoid(gz_ref[t] + gh_z)
        n = jnp.tanh(gn_ref[t] + r * gh_n)
        h_new = (1.0 - z) * n + z * h
        if masked:  # only emitted when T was padded up to a multiple of TBLK
            h_new = jnp.where(t0 + t < seq_len, h_new, h)
        return h_new

    h = lax.fori_loop(0, tblk, step, h_acc[...], unroll=True)
    h_acc[...] = h

    @pl.when(tb == pl.num_programs(0) - 1)
    def _():
        h_out_ref[...] = h_acc[...].astype(h_out_ref.dtype)


# --------------------------------------------------------------------------------------
# Phase 3: final Linear, tiled over the vocab axis
# --------------------------------------------------------------------------------------
def fc_kernel(h_ref, wfc_ref, bfc_ref, out_ref):
    """h_ref: (B, H); wfc_ref: (H, TV) tile of W_fc^T; bfc_ref: (1, TV); out_ref: (B, TV)."""
    out_ref[...] = (jnp.dot(h_ref[...], wfc_ref[...],
                            preferred_element_type=jnp.float32)
                    + bfc_ref[...]).astype(out_ref.dtype)


# --------------------------------------------------------------------------------------
# Wrapper
# --------------------------------------------------------------------------------------
def text_generator_forward(x_tokens, params, *, tblk=16, tv_max=512):
    """x_tokens: (B, T) int32 token ids. Returns (B, V) float32 logits
    matching PyTorch `fc(gru(embedding(x))[0][:, -1, :])`."""
    emb = params["embedding"]                       # (V, E)
    B, T = x_tokens.shape
    E = emb.shape[1]
    H = params["w_hh"].shape[1]
    V = params["w_fc"].shape[0]

    B_pad = _round_up(B, 8)                         # fill the f32 sublanes
    TBLK = min(tblk, _round_up(T, 8))               # timesteps per grid step
    T_pad = _round_up(T, TBLK)
    NT = T_pad // TBLK
    RB = TBLK * B_pad                               # matmul rows per proj grid step

    # Glue: time-major token gather (pads in time/batch; only (B,T) ids transposed).
    tok = jnp.zeros((T_pad, B_pad), x_tokens.dtype).at[:T, :B].set(x_tokens.T)
    x2d = emb[tok].reshape(T_pad * B_pad, E)        # (T_pad*B_pad, E)
    # TODO(synk): embedding gather could move in-kernel via scalar-prefetched ids.

    # Weight prep: gate-major layouts (leading gate axis => free slicing), biases folded.
    w_ih_g = params["w_ih"].reshape(3, H, E).transpose(0, 2, 1)   # (3, E, H)
    w_hh_g = params["w_hh"].reshape(3, H, H).transpose(0, 2, 1)   # (3, H, H)
    b_ih_g = params["b_ih"].reshape(3, 1, H)
    b_hh_g = params["b_hh"].reshape(3, 1, H)
    # r,z gates: both biases fold into the precomputed input projection.
    # n gate: b_in folds in; b_hn must stay in the recurrence (multiplied by r).
    b_gi = jnp.concatenate([b_ih_g[:2] + b_hh_g[:2], b_ih_g[2:]], axis=0)   # (3, 1, H)
    b_hn = b_hh_g[2]                                                        # (1, H)

    cp_parallel = pltpu.CompilerParams(dimension_semantics=("parallel",),
                                       vmem_limit_bytes=32 * 1024 * 1024)
    cp_serial = pltpu.CompilerParams(dimension_semantics=("arbitrary",),
                                     vmem_limit_bytes=32 * 1024 * 1024)

    # ---- Phase 1: input projection --------------------------------------------------
    gi_shape = jax.ShapeDtypeStruct((T_pad * B_pad, H), jnp.float32)
    g_r, g_z, g_n = pl.pallas_call(
        input_proj_kernel,
        out_shape=(gi_shape, gi_shape, gi_shape),
        grid=(NT,),
        in_specs=[pl.BlockSpec((RB, E), lambda i: (i, 0)),
                  pl.BlockSpec((3, E, H), lambda i: (0, 0, 0)),
                  pl.BlockSpec((3, 1, H), lambda i: (0, 0, 0))],
        out_specs=(pl.BlockSpec((RB, H), lambda i: (i, 0)),) * 3,
        compiler_params=cp_parallel,
    )(x2d, w_ih_g, b_gi)

    # Free (contiguous) reshapes back to (time, batch, hidden).
    g_r = g_r.reshape(T_pad, B_pad, H)
    g_z = g_z.reshape(T_pad, B_pad, H)
    g_n = g_n.reshape(T_pad, B_pad, H)

    # ---- Phase 2: GRU recurrence, streaming TBLK timesteps per grid step -------------
    h_last = pl.pallas_call(
        functools.partial(gru_recurrence_kernel, tblk=TBLK, seq_len=T,
                          masked=(T_pad != T)),
        out_shape=jax.ShapeDtypeStruct((B_pad, H), jnp.float32),
        grid=(NT,),
        in_specs=[pl.BlockSpec((TBLK, B_pad, H), lambda i: (i, 0, 0)),
                  pl.BlockSpec((TBLK, B_pad, H), lambda i: (i, 0, 0)),
                  pl.BlockSpec((TBLK, B_pad, H), lambda i: (i, 0, 0)),
                  pl.BlockSpec((3, H, H), lambda i: (0, 0, 0)),
                  pl.BlockSpec((1, H), lambda i: (0, 0))],
        out_specs=pl.BlockSpec((B_pad, H), lambda i: (0, 0)),
        scratch_shapes=[pltpu.VMEM((B_pad, H), jnp.float32)],
        compiler_params=cp_serial,
    )(g_r, g_z, g_n, w_hh_g, b_hn)

    # ---- Phase 3: fc(h_T) tiled over the vocab axis ----------------------------------
    V_lane = _round_up(V, 128)
    TV = min(tv_max, V_lane)                        # lane-dense tile, multiple of 128
    V_pad = _round_up(V, TV)
    w_fc_t = jnp.zeros((H, V_pad), jnp.float32).at[:, :V].set(params["w_fc"].T)
    b_fc_p = jnp.zeros((1, V_pad), jnp.float32).at[:, :V].set(
        params["b_fc"].reshape(1, V))

    logits = pl.pallas_call(
        fc_kernel,
        out_shape=jax.ShapeDtypeStruct((B_pad, V_pad), jnp.float32),
        grid=(V_pad // TV,),
        in_specs=[pl.BlockSpec((B_pad, H), lambda j: (0, 0)),
                  pl.BlockSpec((H, TV), lambda j: (0, j)),
                  pl.BlockSpec((1, TV), lambda j: (0, j))],
        out_specs=pl.BlockSpec((B_pad, TV), lambda j: (0, j)),
        compiler_params=cp_parallel,
    )(h_last, w_fc_t, b_fc_p)

    return logits[:B, :V]


# --------------------------------------------------------------------------------------
# Params / reference
# --------------------------------------------------------------------------------------
def init_params(key, vocab_size, embedding_dim, hidden_dim):
    ks = jax.random.split(key, 7)
    scale = 0.1
    return {
        "embedding": scale * jax.random.normal(ks[0], (vocab_size, embedding_dim), jnp.float32),
        # PyTorch GRU weight_ih_l0: (3H, E), gate order [r, z, n]
        "w_ih": scale * jax.random.normal(ks[1], (3 * hidden_dim, embedding_dim), jnp.float32),
        "w_hh": scale * jax.random.normal(ks[2], (3 * hidden_dim, hidden_dim), jnp.float32),
        "b_ih": scale * jax.random.normal(ks[3], (3 * hidden_dim,), jnp.float32),
        "b_hh": scale * jax.random.normal(ks[4], (3 * hidden_dim,), jnp.float32),
        # nn.Linear(hidden_dim, vocab_size): weight (V, H), bias (V,)
        "w_fc": scale * jax.random.normal(ks[5], (vocab_size, hidden_dim), jnp.float32),
        "b_fc": scale * jax.random.normal(ks[6], (vocab_size,), jnp.float32),
    }


def reference_forward(x_tokens, params):
    """Pure-JAX replica of the PyTorch forward for a sanity check."""
    emb = params["embedding"][x_tokens]            # (B, T, E)
    B, T, _ = emb.shape
    H = params["w_hh"].shape[1]
    h = jnp.zeros((B, H), jnp.float32)
    for t in range(T):
        x_t = emb[:, t, :]
        gi = x_t @ params["w_ih"].T + params["b_ih"]
        gh = h @ params["w_hh"].T + params["b_hh"]
        i_r, i_z, i_n = gi[:, :H], gi[:, H:2 * H], gi[:, 2 * H:]
        h_r, h_z, h_n = gh[:, :H], gh[:, H:2 * H], gh[:, 2 * H:]
        r = jax.nn.sigmoid(i_r + h_r)
        z = jax.nn.sigmoid(i_z + h_z)
        n = jnp.tanh(i_n + r * h_n)
        h = (1.0 - z) * n + z * h
    return h @ params["w_fc"].T + params["b_fc"]


if __name__ == "__main__":
    VOCAB, EMB, HID = 64, 32, 32
    B, T = 2, 8

    key = jax.random.PRNGKey(0)
    pkey, xkey = jax.random.split(key)
    params = init_params(pkey, VOCAB, EMB, HID)
    x = jax.random.randint(xkey, (B, T), 0, VOCAB, dtype=jnp.int32)

    logits = jax.jit(text_generator_forward)(x, params)
    logits = jax.block_until_ready(logits)

    ref = reference_forward(x, params)
    assert logits.shape == (B, VOCAB), logits.shape
    max_err = float(jnp.max(jnp.abs(logits - ref)))
    assert max_err < 1e-4, max_err
    print("KERNEL_OK")
</pallas_src>

<mosaic_0001>
module attributes {stable_mosaic.version = 11 : i64} {
  func.func @input_proj_kernel(%arg0: i32, %arg1: memref<64x32xf32, #tpu.memory_space<vmem>>, %arg2: memref<3x32x32xf32, #tpu.memory_space<vmem>>, %arg3: memref<3x1x32xf32, #tpu.memory_space<vmem>>, %arg4: memref<64x32xf32, #tpu.memory_space<vmem>>, %arg5: memref<64x32xf32, #tpu.memory_space<vmem>>, %arg6: memref<64x32xf32, #tpu.memory_space<vmem>>) attributes {dimension_semantics = [#tpu.dimension_semantics<parallel>], iteration_bounds = array<i64: 1>, scalar_prefetch = 0 : i64, scratch_operands = 0 : i64, tpu.core_type = #tpu.core_type<tc>, window_params = [{transform_indices = @transform_0, window_bounds = array<i64: 64, 32>}, {pipeline_mode = #tpu.pipeline_mode<synchronous>, transform_indices = @transform_1, window_bounds = array<i64: 3, 32, 32>}, {pipeline_mode = #tpu.pipeline_mode<synchronous>, transform_indices = @transform_2, window_bounds = array<i64: 3, 1, 32>}, {transform_indices = @transform_3, window_bounds = array<i64: 64, 32>}, {transform_indices = @transform_4, window_bounds = array<i64: 64, 32>}, {transform_indices = @transform_5, window_bounds = array<i64: 64, 32>}]} {
    %c0 = arith.constant 0 : index
    %c0_0 = arith.constant 0 : index
    %0 = vector.load %arg1[%c0, %c0_0] : memref<64x32xf32, #tpu.memory_space<vmem>>, vector<64x32xf32>
    %c0_1 = arith.constant 0 : index
    %c0_2 = arith.constant 0 : index
    %c0_3 = arith.constant 0 : index
    %1 = vector.load %arg2[%c0_1, %c0_2, %c0_3] : memref<3x32x32xf32, #tpu.memory_space<vmem>>, vector<1x32x32xf32>
    %2 = vector.shape_cast %1 : vector<1x32x32xf32> to vector<32x32xf32>
    %cst = arith.constant dense<0.000000e+00> : vector<64x32xf32>
    %3 = tpu.matmul %0, %2, %cst {dimension_numbers = #tpu.dot_dimension_numbers<[1], [0], [0], [1], [0, 0, 1, 1], [], []>} : vector<64x32xf32>, vector<32x32xf32>, vector<64x32xf32> -> vector<64x32xf32>
    %c0_4 = arith.constant 0 : index
    %c0_5 = arith.constant 0 : index
    %c0_6 = arith.constant 0 : index
    %4 = vector.load %arg3[%c0_4, %c0_5, %c0_6] : memref<3x1x32xf32, #tpu.memory_space<vmem>>, vector<1x1x32xf32>
    %5 = vector.shape_cast %4 : vector<1x1x32xf32> to vector<1x32xf32>
    %6 = vector.broadcast %5 : vector<1x32xf32> to vector<64x32xf32>
    %7 = arith.addf %3, %6 : vector<64x32xf32>
    %c0_7 = arith.constant 0 : index
    %c0_8 = arith.constant 0 : index
    %8 = vector.load %arg4[%c0_7, %c0_8] : memref<64x32xf32, #tpu.memory_space<vmem>>, vector<64x32xf32>
    tpu.vector_store %arg4[%c0_7, %c0_8], %7 {strides = array<i32>} : memref<64x32xf32, #tpu.memory_space<vmem>>, vector<64x32xf32>,
    %c1 = arith.constant 1 : index
    %c0_9 = arith.constant 0 : index
    %c0_10 = arith.constant 0 : index
    %9 = vector.load %arg2[%c1, %c0_9, %c0_10] : memref<3x32x32xf32, #tpu.memory_space<vmem>>, vector<1x32x32xf32>
    %10 = vector.shape_cast %9 : vector<1x32x32xf32> to vector<32x32xf32>
    %cst_11 = arith.constant dense<0.000000e+00> : vector<64x32xf32>
    %11 = tpu.matmul %0, %10, %cst_11 {dimension_numbers = #tpu.dot_dimension_numbers<[1], [0], [0], [1], [0, 0, 1, 1], [], []>} : vector<64x32xf32>, vector<32x32xf32>, vector<64x32xf32> -> vector<64x32xf32>
    %c1_12 = arith.constant 1 : index
    %c0_13 = arith.constant 0 : index
    %c0_14 = arith.constant 0 : index
    %12 = vector.load %arg3[%c1_12, %c0_13, %c0_14] : memref<3x1x32xf32, #tpu.memory_space<vmem>>, vector<1x1x32xf32>
    %13 = vector.shape_cast %12 : vector<1x1x32xf32> to vector<1x32xf32>
    %14 = vector.broadcast %13 : vector<1x32xf32> to vector<64x32xf32>
    %15 = arith.addf %11, %14 : vector<64x32xf32>
    %c0_15 = arith.constant 0 : index
    %c0_16 = arith.constant 0 : index
    %16 = vector.load %arg5[%c0_15, %c0_16] : memref<64x32xf32, #tpu.memory_space<vmem>>, vector<64x32xf32>
    tpu.vector_store %arg5[%c0_15, %c0_16], %15 {strides = array<i32>} : memref<64x32xf32, #tpu.memory_space<vmem>>, vector<64x32xf32>,
    %c2 = arith.constant 2 : index
    %c0_17 = arith.constant 0 : index
    %c0_18 = arith.constant 0 : index
    %17 = vector.load %arg2[%c2, %c0_17, %c0_18] : memref<3x32x32xf32, #tpu.memory_space<vmem>>, vector<1x32x32xf32>
    %18 = vector.shape_cast %17 : vector<1x32x32xf32> to vector<32x32xf32>
    %cst_19 = arith.constant dense<0.000000e+00> : vector<64x32xf32>
    %19 = tpu.matmul %0, %18, %cst_19 {dimension_numbers = #tpu.dot_dimension_numbers<[1], [0], [0], [1], [0, 0, 1, 1], [], []>} : vector<64x32xf32>, vector<32x32xf32>, vector<64x32xf32> -> vector<64x32xf32>
    %c2_20 = arith.constant 2 : index
    %c0_21 = arith.constant 0 : index
    %c0_22 = arith.constant 0 : index
    %20 = vector.load %arg3[%c2_20, %c0_21, %c0_22] : memref<3x1x32xf32, #tpu.memory_space<vmem>>, vector<1x1x32xf32>
    %21 = vector.shape_cast %20 : vector<1x1x32xf32> to vector<1x32xf32>
    %22 = vector.broadcast %21 : vector<1x32xf32> to vector<64x32xf32>
    %23 = arith.addf %19, %22 : vector<64x32xf32>
    %c0_23 = arith.constant 0 : index
    %c0_24 = arith.constant 0 : index
    %24 = vector.load %arg6[%c0_23, %c0_24] : memref<64x32xf32, #tpu.memory_space<vmem>>, vector<64x32xf32>
    tpu.vector_store %arg6[%c0_23, %c0_24], %23 {strides = array<i32>} : memref<64x32xf32, #tpu.memory_space<vmem>>, vector<64x32xf32>,
    return
  }
  func.func @transform_0(%arg0: i32) -> (i32, i32) {
    %c0_i32 = arith.constant 0 : i32
    %c0_i32_0 = arith.constant 0 : i32
    return %arg0, %c0_i32 : i32, i32
  }
  func.func @transform_1(%arg0: i32) -> (i32, i32, i32) {
    %c0_i32 = arith.constant 0 : i32
    %c0_i32_0 = arith.constant 0 : i32
    %c0_i32_1 = arith.constant 0 : i32
    %c0_i32_2 = arith.constant 0 : i32
    return %c0_i32, %c0_i32_0, %c0_i32_1 : i32, i32, i32
  }
  func.func @transform_2(%arg0: i32) -> (i32, i32, i32) {
    %c0_i32 = arith.constant 0 : i32
    %c0_i32_0 = arith.constant 0 : i32
    %c0_i32_1 = arith.constant 0 : i32
    %c0_i32_2 = arith.constant 0 : i32
    return %c0_i32, %c0_i32_0, %c0_i32_1 : i32, i32, i32
  }
  func.func @transform_3(%arg0: i32) -> (i32, i32) {
    %c0_i32 = arith.constant 0 : i32
    %c0_i32_0 = arith.constant 0 : i32
    return %arg0, %c0_i32 : i32, i32
  }
  func.func @transform_4(%arg0: i32) -> (i32, i32) {
    %c0_i32 = arith.constant 0 : i32
    %c0_i32_0 = arith.constant 0 : i32
    return %arg0, %c0_i32 : i32, i32
  }
  func.func @transform_5(%arg0: i32) -> (i32, i32) {
    %c0_i32 = arith.constant 0 : i32
    %c0_i32_0 = arith.constant 0 : i32
    return %arg0, %c0_i32 : i32, i32
  }
}

module attributes {stable_mosaic.version = 11 : i64} {
  func.func @gru_recurrence_kernel(%arg0: i32, %arg1: memref<8x8x32xf32, #tpu.memory_space<vmem>>, %arg2: memref<8x8x32xf32, #tpu.memory_space<vmem>>, %arg3: memref<8x8x32xf32, #tpu.memory_space<vmem>>, %arg4: memref<3x32x32xf32, #tpu.memory_space<vmem>>, %arg5: memref<1x32xf32, #tpu.memory_space<vmem>>, %arg6: memref<8x32xf32, #tpu.memory_space<vmem>>, %arg7: memref<8x32xf32, #tpu.memory_space<vmem>>) attributes {dimension_semantics = [#tpu.dimension_semantics<arbitrary>], iteration_bounds = array<i64: 1>, scalar_prefetch = 0 : i64, scratch_operands = 1 : i64, tpu.core_type = #tpu.core_type<tc>, window_params = [{transform_indices = @transform_0, window_bounds = array<i64: 8, 8, 32>}, {transform_indices = @transform_1, window_bounds = array<i64: 8, 8, 32>}, {transform_indices = @transform_2, window_bounds = array<i64: 8, 8, 32>}, {pipeline_mode = #tpu.pipeline_mode<synchronous>, transform_indices = @transform_3, window_bounds = array<i64: 3, 32, 32>}, {pipeline_mode = #tpu.pipeline_mode<synchronous>, transform_indices = @transform_4, window_bounds = array<i64: 1, 32>}, {pipeline_mode = #tpu.pipeline_mode<synchronous>, transform_indices = @transform_5, window_bounds = array<i64: 8, 32>}]} {
    %c0_i32 = arith.constant 0 : i32
    %0 = arith.cmpi eq, %arg0, %c0_i32 : i32
    %1 = arith.extui %0 : i1 to i32
    %c0_i32_0 = arith.constant 0 : i32
    %2 = arith.cmpi ne, %1, %c0_i32_0 : i32
    scf.if %2 {
      %cst_111 = arith.constant 0.000000e+00 : f32
      %281 = vector.broadcast %cst_111 : f32 to vector<8x32xf32>
      %c0_112 = arith.constant 0 : index
      %c0_113 = arith.constant 0 : index
      %282 = vector.load %arg7[%c0_112, %c0_113] : memref<8x32xf32, #tpu.memory_space<vmem>>, vector<8x32xf32>
      tpu.vector_store %arg7[%c0_112, %c0_113], %281 {strides = array<i32>} : memref<8x32xf32, #tpu.memory_space<vmem>>, vector<8x32xf32>,
    } else {
    }
    %c0 = arith.constant 0 : index
    %c0_1 = arith.constant 0 : index
    %c0_2 = arith.constant 0 : index
    %3 = vector.load %arg4[%c0, %c0_1, %c0_2] : memref<3x32x32xf32, #tpu.memory_space<vmem>>, vector<1x32x32xf32>
    %4 = vector.shape_cast %3 : vector<1x32x32xf32> to vector<32x32xf32>
    %c1 = arith.constant 1 : index
    %c0_3 = arith.constant 0 : index
    %c0_4 = arith.constant 0 : index
    %5 = vector.load %arg4[%c1, %c0_3, %c0_4] : memref<3x32x32xf32, #tpu.memory_space<vmem>>, vector<1x32x32xf32>
    %6 = vector.shape_cast %5 : vector<1x32x32xf32> to vector<32x32xf32>
    %c2 = arith.constant 2 : index
    %c0_5 = arith.constant 0 : index
    %c0_6 = arith.constant 0 : index
    %7 = vector.load %arg4[%c2, %c0_5, %c0_6] : memref<3x32x32xf32, #tpu.memory_space<vmem>>, vector<1x32x32xf32>
    %8 = vector.shape_cast %7 : vector<1x32x32xf32> to vector<32x32xf32>
    %c0_7 = arith.constant 0 : index
    %c0_8 = arith.constant 0 : index
    %9 = vector.load %arg5[%c0_7, %c0_8] : memref<1x32xf32, #tpu.memory_space<vmem>>, vector<1x32xf32>
    %10 = vector.shape_cast %9 : vector<1x32xf32> to vector<1x32xf32>
    %11 = vector.broadcast %10 : vector<1x32xf32> to vector<8x32xf32>
    %c0_9 = arith.constant 0 : index
    %c0_10 = arith.constant 0 : index
    %12 = vector.load %arg7[%c0_9, %c0_10] : memref<8x32xf32, #tpu.memory_space<vmem>>, vector<8x32xf32>
    %c0_i32_11 = arith.constant 0 : i32
    %cst = arith.constant dense<0.000000e+00> : vector<8x32xf32>
    %13 = tpu.matmul %12, %4, %cst {dimension_numbers = #tpu.dot_dimension_numbers<[1], [0], [0], [1], [0, 0, 1, 1], [], []>} : vector<8x32xf32>, vector<32x32xf32>, vector<8x32xf32> -> vector<8x32xf32>
    %cst_12 = arith.constant dense<0.000000e+00> : vector<8x32xf32>
    %14 = tpu.matmul %12, %6, %cst_12 {dimension_numbers = #tpu.dot_dimension_numbers<[1], [0], [0], [1], [0, 0, 1, 1], [], []>} : vector<8x32xf32>, vector<32x32xf32>, vector<8x32xf32> -> vector<8x32xf32>
    %cst_13 = arith.constant dense<0.000000e+00> : vector<8x32xf32>
    %15 = tpu.matmul %12, %8, %cst_13 {dimension_numbers = #tpu.dot_dimension_numbers<[1], [0], [0], [1], [0, 0, 1, 1], [], []>} : vector<8x32xf32>, vector<32x32xf32>, vector<8x32xf32> -> vector<8x32xf32>
    %16 = arith.addf %15, %11 : vector<8x32xf32>
    %17 = arith.index_cast %c0_i32_11 : i32 to index
    %c0_14 = arith.constant 0 : index
    %c0_15 = arith.constant 0 : index
    %18 = vector.load %arg1[%17, %c0_14, %c0_15] : memref<8x8x32xf32, #tpu.memory_space<vmem>>, vector<1x8x32xf32>
    %19 = vector.shape_cast %18 : vector<1x8x32xf32> to vector<8x32xf32>
    %20 = arith.addf %19, %13 : vector<8x32xf32>
    %21 = arith.negf %20 : vector<8x32xf32>
    %22 = math.exp %21 : vector<8x32xf32>
    %cst_16 = arith.constant 1.000000e+00 : f32
    %23 = vector.broadcast %cst_16 : f32 to vector<8x32xf32>
    %24 = arith.addf %23, %22 : vector<8x32xf32>
    %25 = arith.divf %23, %24 : vector<8x32xf32>
    %26 = arith.index_cast %c0_i32_11 : i32 to index
    %c0_17 = arith.constant 0 : index
    %c0_18 = arith.constant 0 : index
    %27 = vector.load %arg2[%26, %c0_17, %c0_18] : memref<8x8x32xf32, #tpu.memory_space<vmem>>, vector<1x8x32xf32>
    %28 = vector.shape_cast %27 : vector<1x8x32xf32> to vector<8x32xf32>
    %29 = arith.addf %28, %14 : vector<8x32xf32>
    %30 = arith.negf %29 : vector<8x32xf32>
    %31 = math.exp %30 : vector<8x32xf32>
    %cst_19 = arith.constant 1.000000e+00 : f32
    %32 = vector.broadcast %cst_19 : f32 to vector<8x32xf32>
    %33 = arith.addf %32, %31 : vector<8x32xf32>
    %34 = arith.divf %32, %33 : vector<8x32xf32>
    %35 = arith.index_cast %c0_i32_11 : i32 to index
    %c0_20 = arith.constant 0 : index
    %c0_21 = arith.constant 0 : index
    %36 = vector.load %arg3[%35, %c0_20, %c0_21] : memref<8x8x32xf32, #tpu.memory_space<vmem>>, vector<1x8x32xf32>
    %37 = vector.shape_cast %36 : vector<1x8x32xf32> to vector<8x32xf32>
    %38 = arith.mulf %25, %16 : vector<8x32xf32>
    %39 = arith.addf %37, %38 : vector<8x32xf32>
    %40 = math.tanh %39 : vector<8x32xf32>
    %cst_22 = arith.constant 1.000000e+00 : f32
    %41 = vector.broadcast %cst_22 : f32 to vector<8x32xf32>
    %42 = arith.subf %41, %34 : vector<8x32xf32>
    %43 = arith.mulf %42, %40 : vector<8x32xf32>
    %44 = arith.mulf %34, %12 : vector<8x32xf32>
    %45 = arith.addf %43, %44 : vector<8x32xf32>
    %c1_i32 = arith.constant 1 : i32
    %cst_23 = arith.constant dense<0.000000e+00> : vector<8x32xf32>
    %46 = tpu.matmul %45, %4, %cst_23 {dimension_numbers = #tpu.dot_dimension_numbers<[1], [0], [0], [1], [0, 0, 1, 1], [], []>} : vector<8x32xf32>, vector<32x32xf32>, vector<8x32xf32> -> vector<8x32xf32>
    %cst_24 = arith.constant dense<0.000000e+00> : vector<8x32xf32>
    %47 = tpu.matmul %45, %6, %cst_24 {dimension_numbers = #tpu.dot_dimension_numbers<[1], [0], [0], [1], [0, 0, 1, 1], [], []>} : vector<8x32xf32>, vector<32x32xf32>, vector<8x32xf32> -> vector<8x32xf32>
    %cst_25 = arith.constant dense<0.000000e+00> : vector<8x32xf32>
    %48 = tpu.matmul %45, %8, %cst_25 {dimension_numbers = #tpu.dot_dimension_numbers<[1], [0], [0], [1], [0, 0, 1, 1], [], []>} : vector<8x32xf32>, vector<32x32xf32>, vector<8x32xf32> -> vector<8x32xf32>
    %49 = arith.addf %48, %11 : vector<8x32xf32>
    %50 = arith.index_cast %c1_i32 : i32 to index
    %c0_26 = arith.constant 0 : index
    %c0_27 = arith.constant 0 : index
    %51 = vector.load %arg1[%50, %c0_26, %c0_27] : memref<8x8x32xf32, #tpu.memory_space<vmem>>, vector<1x8x32xf32>
    %52 = vector.shape_cast %51 : vector<1x8x32xf32> to vector<8x32xf32>
    %53 = arith.addf %52, %46 : vector<8x32xf32>
    %54 = arith.negf %53 : vector<8x32xf32>
    %55 = math.exp %54 : vector<8x32xf32>
    %cst_28 = arith.constant 1.000000e+00 : f32
    %56 = vector.broadcast %cst_28 : f32 to vector<8x32xf32>
    %57 = arith.addf %56, %55 : vector<8x32xf32>
    %58 = arith.divf %56, %57 : vector<8x32xf32>
    %59 = arith.index_cast %c1_i32 : i32 to index
    %c0_29 = arith.constant 0 : index
    %c0_30 = arith.constant 0 : index
    %60 = vector.load %arg2[%59, %c0_29, %c0_30] : memref<8x8x32xf32, #tpu.memory_space<vmem>>, vector<1x8x32xf32>
    %61 = vector.shape_cast %60 : vector<1x8x32xf32> to vector<8x32xf32>
    %62 = arith.addf %61, %47 : vector<8x32xf32>
    %63 = arith.negf %62 : vector<8x32xf32>
    %64 = math.exp %63 : vector<8x32xf32>
    %cst_31 = arith.constant 1.000000e+00 : f32
    %65 = vector.broadcast %cst_31 : f32 to vector<8x32xf32>
    %66 = arith.addf %65, %64 : vector<8x32xf32>
    %67 = arith.divf %65, %66 : vector<8x32xf32>
    %68 = arith.index_cast %c1_i32 : i32 to index
    %c0_32 = arith.constant 0 : index
    %c0_33 = arith.constant 0 : index
    %69 = vector.load %arg3[%68, %c0_32, %c0_33] : memref<8x8x32xf32, #tpu.memory_space<vmem>>, vector<1x8x32xf32>
    %70 = vector.shape_cast %69 : vector<1x8x32xf32> to vector<8x32xf32>
    %71 = arith.mulf %58, %49 : vector<8x32xf32>
    %72 = arith.addf %70, %71 : vector<8x32xf32>
    %73 = math.tanh %72 : vector<8x32xf32>
    %cst_34 = arith.constant 1.000000e+00 : f32
    %74 = vector.broadcast %cst_34 : f32 to vector<8x32xf32>
    %75 = arith.subf %74, %67 : vector<8x32xf32>
    %76 = arith.mulf %75, %73 : vector<8x32xf32>
    %77 = arith.mulf %67, %45 : vector<8x32xf32>
    %78 = arith.addf %76, %77 : vector<8x32xf32>
    %c2_i32 = arith.constant 2 : i32
    %cst_35 = arith.constant dense<0.000000e+00> : vector<8x32xf32>
    %79 = tpu.matmul %78, %4, %cst_35 {dimension_numbers = #tpu.dot_dimension_numbers<[1], [0], [0], [1], [0, 0, 1, 1], [], []>} : vector<8x32xf32>, vector<32x32xf32>, vector<8x32xf32> -> vector<8x32xf32>
    %cst_36 = arith.constant dense<0.000000e+00> : vector<8x32xf32>
    %80 = tpu.matmul %78, %6, %cst_36 {dimension_numbers = #tpu.dot_dimension_numbers<[1], [0], [0], [1], [0, 0, 1, 1], [], []>} : vector<8x32xf32>, vector<32x32xf32>, vector<8x32xf32> -> vector<8x32xf32>
    %cst_37 = arith.constant dense<0.000000e+00> : vector<8x32xf32>
    %81 = tpu.matmul %78, %8, %cst_37 {dimension_numbers = #tpu.dot_dimension_numbers<[1], [0], [0], [1], [0, 0, 1, 1], [], []>} : vector<8x32xf32>, vector<32x32xf32>, vector<8x32xf32> -> vector<8x32xf32>
    %82 = arith.addf %81, %11 : vector<8x32xf32>
    %83 = arith.index_cast %c2_i32 : i32 to index
    %c0_38 = arith.constant 0 : index
    %c0_39 = arith.constant 0 : index
    %84 = vector.load %arg1[%83, %c0_38, %c0_39] : memref<8x8x32xf32, #tpu.memory_space<vmem>>, vector<1x8x32xf32>
    %85 = vector.shape_cast %84 : vector<1x8x32xf32> to vector<8x32xf32>
    %86 = arith.addf %85, %79 : vector<8x32xf32>
    %87 = arith.negf %86 : vector<8x32xf32>
    %88 = math.exp %87 : vector<8x32xf32>
    %cst_40 = arith.constant 1.000000e+00 : f32
    %89 = vector.broadcast %cst_40 : f32 to vector<8x32xf32>
    %90 = arith.addf %89, %88 : vector<8x32xf32>
    %91 = arith.divf %89, %90 : vector<8x32xf32>
    %92 = arith.index_cast %c2_i32 : i32 to index
    %c0_41 = arith.constant 0 : index
    %c0_42 = arith.constant 0 : index
    %93 = vector.load %arg2[%92, %c0_41, %c0_42] : memref<8x8x32xf32, #tpu.memory_space<vmem>>, vector<1x8x32xf32>
    %94 = vector.shape_cast %93 : vector<1x8x32xf32> to vector<8x32xf32>
    %95 = arith.addf %94, %80 : vector<8x32xf32>
    %96 = arith.negf %95 : vector<8x32xf32>
    %97 = math.exp %96 : vector<8x32xf32>
    %cst_43 = arith.constant 1.000000e+00 : f32
    %98 = vector.broadcast %cst_43 : f32 to vector<8x32xf32>
    %99 = arith.addf %98, %97 : vector<8x32xf32>
    %100 = arith.divf %98, %99 : vector<8x32xf32>
    %101 = arith.index_cast %c2_i32 : i32 to index
    %c0_44 = arith.constant 0 : index
    %c0_45 = arith.constant 0 : index
    %102 = vector.load %arg3[%101, %c0_44, %c0_45] : memref<8x8x32xf32, #tpu.memory_space<vmem>>, vector<1x8x32xf32>
    %103 = vector.shape_cast %102 : vector<1x8x32xf32> to vector<8x32xf32>
    %104 = arith.mulf %91, %82 : vector<8x32xf32>
    %105 = arith.addf %103, %104 : vector<8x32xf32>
    %106 = math.tanh %105 : vector<8x32xf32>
    %cst_46 = arith.constant 1.000000e+00 : f32
    %107 = vector.broadcast %cst_46 : f32 to vector<8x32xf32>
    %108 = arith.subf %107, %100 : vector<8x32xf32>
    %109 = arith.mulf %108, %106 : vector<8x32xf32>
    %110 = arith.mulf %100, %78 : vector<8x32xf32>
    %111 = arith.addf %109, %110 : vector<8x32xf32>
    %c3_i32 = arith.constant 3 : i32
    %cst_47 = arith.constant dense<0.000000e+00> : vector<8x32xf32>
    %112 = tpu.matmul %111, %4, %cst_47 {dimension_numbers = #tpu.dot_dimension_numbers<[1], [0], [0], [1], [0, 0, 1, 1], [], []>} : vector<8x32xf32>, vector<32x32xf32>, vector<8x32xf32> -> vector<8x32xf32>
    %cst_48 = arith.constant dense<0.000000e+00> : vector<8x32xf32>
    %113 = tpu.matmul %111, %6, %cst_48 {dimension_numbers = #tpu.dot_dimension_numbers<[1], [0], [0], [1], [0, 0, 1, 1], [], []>} : vector<8x32xf32>, vector<32x32xf32>, vector<8x32xf32> -> vector<8x32xf32>
    %cst_49 = arith.constant dense<0.000000e+00> : vector<8x32xf32>
    %114 = tpu.matmul %111, %8, %cst_49 {dimension_numbers = #tpu.dot_dimension_numbers<[1], [0], [0], [1], [0, 0, 1, 1], [], []>} : vector<8x32xf32>, vector<32x32xf32>, vector<8x32xf32> -> vector<8x32xf32>
    %115 = arith.addf %114, %11 : vector<8x32xf32>
    %116 = arith.index_cast %c3_i32 : i32 to index
    %c0_50 = arith.constant 0 : index
    %c0_51 = arith.constant 0 : index
    %117 = vector.load %arg1[%116, %c0_50, %c0_51] : memref<8x8x32xf32, #tpu.memory_space<vmem>>, vector<1x8x32xf32>
    %118 = vector.shape_cast %117 : vector<1x8x32xf32> to vector<8x32xf32>
    %119 = arith.addf %118, %112 : vector<8x32xf32>
    %120 = arith.negf %119 : vector<8x32xf32>
    %121 = math.exp %120 : vector<8x32xf32>
    %cst_52 = arith.constant 1.000000e+00 : f32
    %122 = vector.broadcast %cst_52 : f32 to vector<8x32xf32>
    %123 = arith.addf %122, %121 : vector<8x32xf32>
    %124 = arith.divf %122, %123 : vector<8x32xf32>
    %125 = arith.index_cast %c3_i32 : i32 to index
    %c0_53 = arith.constant 0 : index
    %c0_54 = arith.constant 0 : index
    %126 = vector.load %arg2[%125, %c0_53, %c0_54] : memref<8x8x32xf32, #tpu.memory_space<vmem>>, vector<1x8x32xf32>
    %127 = vector.shape_cast %126 : vector<1x8x32xf32> to vector<8x32xf32>
    %128 = arith.addf %127, %113 : vector<8x32xf32>
    %129 = arith.negf %128 : vector<8x32xf32>
    %130 = math.exp %129 : vector<8x32xf32>
    %cst_55 = arith.constant 1.000000e+00 : f32
    %131 = vector.broadcast %cst_55 : f32 to vector<8x32xf32>
    %132 = arith.addf %131, %130 : vector<8x32xf32>
    %133 = arith.divf %131, %132 : vector<8x32xf32>
    %134 = arith.index_cast %c3_i32 : i32 to index
    %c0_56 = arith.constant 0 : index
    %c0_57 = arith.constant 0 : index
    %135 = vector.load %arg3[%134, %c0_56, %c0_57] : memref<8x8x32xf32, #tpu.memory_space<vmem>>, vector<1x8x32xf32>
    %136 = vector.shape_cast %135 : vector<1x8x32xf32> to vector<8x32xf32>
    %137 = arith.mulf %124, %115 : vector<8x32xf32>
    %138 = arith.addf %136, %137 : vector<8x32xf32>
    %139 = math.tanh %138 : vector<8x32xf32>
    %cst_58 = arith.constant 1.000000e+00 : f32
    %140 = vector.broadcast %cst_58 : f32 to vector<8x32xf32>
    %141 = arith.subf %140, %133 : vector<8x32xf32>
    %142 = arith.mulf %141, %139 : vector<8x32xf32>
    %143 = arith.mulf %133, %111 : vector<8x32xf32>
    %144 = arith.addf %142, %143 : vector<8x32xf32>
    %c4_i32 = arith.constant 4 : i32
    %cst_59 = arith.constant dense<0.000000e+00> : vector<8x32xf32>
    %145 = tpu.matmul %144, %4, %cst_59 {dimension_numbers = #tpu.dot_dimension_numbers<[1], [0], [0], [1], [0, 0, 1, 1], [], []>} : vector<8x32xf32>, vector<32x32xf32>, vector<8x32xf32> -> vector<8x32xf32>
    %cst_60 = arith.constant dense<0.000000e+00> : vector<8x32xf32>
    %146 = tpu.matmul %144, %6, %cst_60 {dimension_numbers = #tpu.dot_dimension_numbers<[1], [0], [0], [1], [0, 0, 1, 1], [], []>} : vector<8x32xf32>, vector<32x32xf32>, vector<8x32xf32> -> vector<8x32xf32>
    %cst_61 = arith.constant dense<0.000000e+00> : vector<8x32xf32>
    %147 = tpu.matmul %144, %8, %cst_61 {dimension_numbers = #tpu.dot_dimension_numbers<[1], [0], [0], [1], [0, 0, 1, 1], [], []>} : vector<8x32xf32>, vector<32x32xf32>, vector<8x32xf32> -> vector<8x32xf32>
    %148 = arith.addf %147, %11 : vector<8x32xf32>
    %149 = arith.index_cast %c4_i32 : i32 to index
    %c0_62 = arith.constant 0 : index
    %c0_63 = arith.constant 0 : index
    %150 = vector.load %arg1[%149, %c0_62, %c0_63] : memref<8x8x32xf32, #tpu.memory_space<vmem>>, vector<1x8x32xf32>
    %151 = vector.shape_cast %150 : vector<1x8x32xf32> to vector<8x32xf32>
    %152 = arith.addf %151, %145 : vector<8x32xf32>
    %153 = arith.negf %152 : vector<8x32xf32>
    %154 = math.exp %153 : vector<8x32xf32>
    %cst_64 = arith.constant 1.000000e+00 : f32
    %155 = vector.broadcast %cst_64 : f32 to vector<8x32xf32>
    %156 = arith.addf %155, %154 : vector<8x32xf32>
    %157 = arith.divf %155, %156 : vector<8x32xf32>
    %158 = arith.index_cast %c4_i32 : i32 to index
    %c0_65 = arith.constant 0 : index
    %c0_66 = arith.constant 0 : index
    %159 = vector.load %arg2[%158, %c0_65, %c0_66] : memref<8x8x32xf32, #tpu.memory_space<vmem>>, vector<1x8x32xf32>
    %160 = vector.shape_cast %159 : vector<1x8x32xf32> to vector<8x32xf32>
    %161 = arith.addf %160, %146 : vector<8x32xf32>
    %162 = arith.negf %161 : vector<8x32xf32>
    %163 = math.exp %162 : vector<8x32xf32>
    %cst_67 = arith.constant 1.000000e+00 : f32
    %164 = vector.broadcast %cst_67 : f32 to vector<8x32xf32>
    %165 = arith.addf %164, %163 : vector<8x32xf32>
    %166 = arith.divf %164, %165 : vector<8x32xf32>
    %167 = arith.index_cast %c4_i32 : i32 to index
    %c0_68 = arith.constant 0 : index
    %c0_69 = arith.constant 0 : index
    %168 = vector.load %arg3[%167, %c0_68, %c0_69] : memref<8x8x32xf32, #tpu.memory_space<vmem>>, vector<1x8x32xf32>
    %169 = vector.shape_cast %168 : vector<1x8x32xf32> to vector<8x32xf32>
    %170 = arith.mulf %157, %148 : vector<8x32xf32>
    %171 = arith.addf %169, %170 : vector<8x32xf32>
    %172 = math.tanh %171 : vector<8x32xf32>
    %cst_70 = arith.constant 1.000000e+00 : f32
    %173 = vector.broadcast %cst_70 : f32 to vector<8x32xf32>
    %174 = arith.subf %173, %166 : vector<8x32xf32>
    %175 = arith.mulf %174, %172 : vector<8x32xf32>
    %176 = arith.mulf %166, %144 : vector<8x32xf32>
    %177 = arith.addf %175, %176 : vector<8x32xf32>
    %c5_i32 = arith.constant 5 : i32
    %cst_71 = arith.constant dense<0.000000e+00> : vector<8x32xf32>
    %178 = tpu.matmul %177, %4, %cst_71 {dimension_numbers = #tpu.dot_dimension_numbers<[1], [0], [0], [1], [0, 0, 1, 1], [], []>} : vector<8x32xf32>, vector<32x32xf32>, vector<8x32xf32> -> vector<8x32xf32>
    %cst_72 = arith.constant dense<0.000000e+00> : vector<8x32xf32>
    %179 = tpu.matmul %177, %6, %cst_72 {dimension_numbers = #tpu.dot_dimension_numbers<[1], [0], [0], [1], [0, 0, 1, 1], [], []>} : vector<8x32xf32>, vector<32x32xf32>, vector<8x32xf32> -> vector<8x32xf32>
    %cst_73 = arith.constant dense<0.000000e+00> : vector<8x32xf32>
    %180 = tpu.matmul %177, %8, %cst_73 {dimension_numbers = #tpu.dot_dimension_numbers<[1], [0], [0], [1], [0, 0, 1, 1], [], []>} : vector<8x32xf32>, vector<32x32xf32>, vector<8x32xf32> -> vector<8x32xf32>
    %181 = arith.addf %180, %11 : vector<8x32xf32>
    %182 = arith.index_cast %c5_i32 : i32 to index
    %c0_74 = arith.constant 0 : index
    %c0_75 = arith.constant 0 : index
    %183 = vector.load %arg1[%182, %c0_74, %c0_75] : memref<8x8x32xf32, #tpu.memory_space<vmem>>, vector<1x8x32xf32>
    %184 = vector.shape_cast %183 : vector<1x8x32xf32> to vector<8x32xf32>
    %185 = arith.addf %184, %178 : vector<8x32xf32>
    %186 = arith.negf %185 : vector<8x32xf32>
    %187 = math.exp %186 : vector<8x32xf32>
    %cst_76 = arith.constant 1.000000e+00 : f32
    %188 = vector.broadcast %cst_76 : f32 to vector<8x32xf32>
    %189 = arith.addf %188, %187 : vector<8x32xf32>
    %190 = arith.divf %188, %189 : vector<8x32xf32>
    %191 = arith.index_cast %c5_i32 : i32 to index
    %c0_77 = arith.constant 0 : index
    %c0_78 = arith.constant 0 : index
    %192 = vector.load %arg2[%191, %c0_77, %c0_78] : memref<8x8x32xf32, #tpu.memory_space<vmem>>, vector<1x8x32xf32>
    %193 = vector.shape_cast %192 : vector<1x8x32xf32> to vector<8x32xf32>
    %194 = arith.addf %193, %179 : vector<8x32xf32>
    %195 = arith.negf %194 : vector<8x32xf32>
    %196 = math.exp %195 : vector<8x32xf32>
    %cst_79 = arith.constant 1.000000e+00 : f32
    %197 = vector.broadcast %cst_79 : f32 to vector<8x32xf32>
    %198 = arith.addf %197, %196 : vector<8x32xf32>
    %199 = arith.divf %197, %198 : vector<8x32xf32>
    %200 = arith.index_cast %c5_i32 : i32 to index
    %c0_80 = arith.constant 0 : index
    %c0_81 = arith.constant 0 : index
    %201 = vector.load %arg3[%200, %c0_80, %c0_81] : memref<8x8x32xf32, #tpu.memory_space<vmem>>, vector<1x8x32xf32>
    %202 = vector.shape_cast %201 : vector<1x8x32xf32> to vector<8x32xf32>
    %203 = arith.mulf %190, %181 : vector<8x32xf32>
    %204 = arith.addf %202, %203 : vector<8x32xf32>
    %205 = math.tanh %204 : vector<8x32xf32>
    %cst_82 = arith.constant 1.000000e+00 : f32
    %206 = vector.broadcast %cst_82 : f32 to vector<8x32xf32>
    %207 = arith.subf %206, %199 : vector<8x32xf32>
    %208 = arith.mulf %207, %205 : vector<8x32xf32>
    %209 = arith.mulf %199, %177 : vector<8x32xf32>
    %210 = arith.addf %208, %209 : vector<8x32xf32>
    %c6_i32 = arith.constant 6 : i32
    %cst_83 = arith.constant dense<0.000000e+00> : vector<8x32xf32>
    %211 = tpu.matmul %210, %4, %cst_83 {dimension_numbers = #tpu.dot_dimension_numbers<[1], [0], [0], [1], [0, 0, 1, 1], [], []>} : vector<8x32xf32>, vector<32x32xf32>, vector<8x32xf32> -> vector<8x32xf32>
    %cst_84 = arith.constant dense<0.000000e+00> : vector<8x32xf32>
    %212 = tpu.matmul %210, %6, %cst_84 {dimension_numbers = #tpu.dot_dimension_numbers<[1], [0], [0], [1], [0, 0, 1, 1], [], []>} : vector<8x32xf32>, vector<32x32xf32>, vector<8x32xf32> -> vector<8x32xf32>
    %cst_85 = arith.constant dense<0.000000e+00> : vector<8x32xf32>
    %213 = tpu.matmul %210, %8, %cst_85 {dimension_numbers = #tpu.dot_dimension_numbers<[1], [0], [0], [1], [0, 0, 1, 1], [], []>} : vector<8x32xf32>, vector<32x32xf32>, vector<8x32xf32> -> vector<8x32xf32>
    %214 = arith.addf %213, %11 : vector<8x32xf32>
    %215 = arith.index_cast %c6_i32 : i32 to index
    %c0_86 = arith.constant 0 : index
    %c0_87 = arith.constant 0 : index
    %216 = vector.load %arg1[%215, %c0_86, %c0_87] : memref<8x8x32xf32, #tpu.memory_space<vmem>>, vector<1x8x32xf32>
    %217 = vector.shape_cast %216 : vector<1x8x32xf32> to vector<8x32xf32>
    %218 = arith.addf %217, %211 : vector<8x32xf32>
    %219 = arith.negf %218 : vector<8x32xf32>
    %220 = math.exp %219 : vector<8x32xf32>
    %cst_88 = arith.constant 1.000000e+00 : f32
    %221 = vector.broadcast %cst_88 : f32 to vector<8x32xf32>
    %222 = arith.addf %221, %220 : vector<8x32xf32>
    %223 = arith.divf %221, %222 : vector<8x32xf32>
    %224 = arith.index_cast %c6_i32 : i32 to index
    %c0_89 = arith.constant 0 : index
    %c0_90 = arith.constant 0 : index
    %225 = vector.load %arg2[%224, %c0_89, %c0_90] : memref<8x8x32xf32, #tpu.memory_space<vmem>>, vector<1x8x32xf32>
    %226 = vector.shape_cast %225 : vector<1x8x32xf32> to vector<8x32xf32>
    %227 = arith.addf %226, %212 : vector<8x32xf32>
    %228 = arith.negf %227 : vector<8x32xf32>
    %229 = math.exp %228 : vector<8x32xf32>
    %cst_91 = arith.constant 1.000000e+00 : f32
    %230 = vector.broadcast %cst_91 : f32 to vector<8x32xf32>
    %231 = arith.addf %230, %229 : vector<8x32xf32>
    %232 = arith.divf %230, %231 : vector<8x32xf32>
    %233 = arith.index_cast %c6_i32 : i32 to index
    %c0_92 = arith.constant 0 : index
    %c0_93 = arith.constant 0 : index
    %234 = vector.load %arg3[%233, %c0_92, %c0_93] : memref<8x8x32xf32, #tpu.memory_space<vmem>>, vector<1x8x32xf32>
    %235 = vector.shape_cast %234 : vector<1x8x32xf32> to vector<8x32xf32>
    %236 = arith.mulf %223, %214 : vector<8x32xf32>
    %237 = arith.addf %235, %236 : vector<8x32xf32>
    %238 = math.tanh %237 : vector<8x32xf32>
    %cst_94 = arith.constant 1.000000e+00 : f32
    %239 = vector.broadcast %cst_94 : f32 to vector<8x32xf32>
    %240 = arith.subf %239, %232 : vector<8x32xf32>
    %241 = arith.mulf %240, %238 : vector<8x32xf32>
    %242 = arith.mulf %232, %210 : vector<8x32xf32>
    %243 = arith.addf %241, %242 : vector<8x32xf32>
    %c7_i32 = arith.constant 7 : i32
    %cst_95 = arith.constant dense<0.000000e+00> : vector<8x32xf32>
    %244 = tpu.matmul %243, %4, %cst_95 {dimension_numbers = #tpu.dot_dimension_numbers<[1], [0], [0], [1], [0, 0, 1, 1], [], []>} : vector<8x32xf32>, vector<32x32xf32>, vector<8x32xf32> -> vector<8x32xf32>
    %cst_96 = arith.constant dense<0.000000e+00> : vector<8x32xf32>
    %245 = tpu.matmul %243, %6, %cst_96 {dimension_numbers = #tpu.dot_dimension_numbers<[1], [0], [0], [1], [0, 0, 1, 1], [], []>} : vector<8x32xf32>, vector<32x32xf32>, vector<8x32xf32> -> vector<8x32xf32>
    %cst_97 = arith.constant dense<0.000000e+00> : vector<8x32xf32>
    %246 = tpu.matmul %243, %8, %cst_97 {dimension_numbers = #tpu.dot_dimension_numbers<[1], [0], [0], [1], [0, 0, 1, 1], [], []>} : vector<8x32xf32>, vector<32x32xf32>, vector<8x32xf32> -> vector<8x32xf32>
    %247 = arith.addf %246, %11 : vector<8x32xf32>
    %248 = arith.index_cast %c7_i32 : i32 to index
    %c0_98 = arith.constant 0 : index
    %c0_99 = arith.constant 0 : index
    %249 = vector.load %arg1[%248, %c0_98, %c0_99] : memref<8x8x32xf32, #tpu.memory_space<vmem>>, vector<1x8x32xf32>
    %250 = vector.shape_cast %249 : vector<1x8x32xf32> to vector<8x32xf32>
    %251 = arith.addf %250, %244 : vector<8x32xf32>
    %252 = arith.negf %251 : vector<8x32xf32>
    %253 = math.exp %252 : vector<8x32xf32>
    %cst_100 = arith.constant 1.000000e+00 : f32
    %254 = vector.broadcast %cst_100 : f32 to vector<8x32xf32>
    %255 = arith.addf %254, %253 : vector<8x32xf32>
    %256 = arith.divf %254, %255 : vector<8x32xf32>
    %257 = arith.index_cast %c7_i32 : i32 to index
    %c0_101 = arith.constant 0 : index
    %c0_102 = arith.constant 0 : index
    %258 = vector.load %arg2[%257, %c0_101, %c0_102] : memref<8x8x32xf32, #tpu.memory_space<vmem>>, vector<1x8x32xf32>
    %259 = vector.shape_cast %258 : vector<1x8x32xf32> to vector<8x32xf32>
    %260 = arith.addf %259, %245 : vector<8x32xf32>
    %261 = arith.negf %260 : vector<8x32xf32>
    %262 = math.exp %261 : vector<8x32xf32>
    %cst_103 = arith.constant 1.000000e+00 : f32
    %263 = vector.broadcast %cst_103 : f32 to vector<8x32xf32>
    %264 = arith.addf %263, %262 : vector<8x32xf32>
    %265 = arith.divf %263, %264 : vector<8x32xf32>
    %266 = arith.index_cast %c7_i32 : i32 to index
    %c0_104 = arith.constant 0 : index
    %c0_105 = arith.constant 0 : index
    %267 = vector.load %arg3[%266, %c0_104, %c0_105] : memref<8x8x32xf32, #tpu.memory_space<vmem>>, vector<1x8x32xf32>
    %268 = vector.shape_cast %267 : vector<1x8x32xf32> to vector<8x32xf32>
    %269 = arith.mulf %256, %247 : vector<8x32xf32>
    %270 = arith.addf %268, %269 : vector<8x32xf32>
    %271 = math.tanh %270 : vector<8x32xf32>
    %cst_106 = arith.constant 1.000000e+00 : f32
    %272 = vector.broadcast %cst_106 : f32 to vector<8x32xf32>
    %273 = arith.subf %272, %265 : vector<8x32xf32>
    %274 = arith.mulf %273, %271 : vector<8x32xf32>
    %275 = arith.mulf %265, %243 : vector<8x32xf32>
    %276 = arith.addf %274, %275 : vector<8x32xf32>
    %c8_i32 = arith.constant 8 : i32
    %c0_107 = arith.constant 0 : index
    %c0_108 = arith.constant 0 : index
    %277 = vector.load %arg7[%c0_107, %c0_108] : memref<8x32xf32, #tpu.memory_space<vmem>>, vector<8x32xf32>
    tpu.vector_store %arg7[%c0_107, %c0_108], %276 {strides = array<i32>} : memref<8x32xf32, #tpu.memory_space<vmem>>, vector<8x32xf32>,
    %c0_i32_109 = arith.constant 0 : i32
    %278 = arith.cmpi eq, %arg0, %c0_i32_109 : i32
    %279 = arith.extui %278 : i1 to i32
    %c0_i32_110 = arith.constant 0 : i32
    %280 = arith.cmpi ne, %279, %c0_i32_110 : i32
    scf.if %280 {
      %c0_111 = arith.constant 0 : index
      %c0_112 = arith.constant 0 : index
      %281 = vector.load %arg7[%c0_111, %c0_112] : memref<8x32xf32, #tpu.memory_space<vmem>>, vector<8x32xf32>
      %c0_113 = arith.constant 0 : index
      %c0_114 = arith.constant 0 : index
      %282 = vector.load %arg6[%c0_113, %c0_114] : memref<8x32xf32, #tpu.memory_space<vmem>>, vector<8x32xf32>
      tpu.vector_store %arg6[%c0_113, %c0_114], %281 {strides = array<i32>} : memref<8x32xf32, #tpu.memory_space<vmem>>, vector<8x32xf32>,
    } else {
    }
    return
  }
  func.func @transform_0(%arg0: i32) -> (i32, i32, i32) {
    %c0_i32 = arith.constant 0 : i32
    %c0_i32_0 = arith.constant 0 : i32
    %c0_i32_1 = arith.constant 0 : i32
    return %arg0, %c0_i32, %c0_i32_0 : i32, i32, i32
  }
  func.func @transform_1(%arg0: i32) -> (i32, i32, i32) {
    %c0_i32 = arith.constant 0 : i32
    %c0_i32_0 = arith.constant 0 : i32
    %c0_i32_1 = arith.constant 0 : i32
    return %arg0, %c0_i32, %c0_i32_0 : i32, i32, i32
  }
  func.func @transform_2(%arg0: i32) -> (i32, i32, i32) {
    %c0_i32 = arith.constant 0 : i32
    %c0_i32_0 = arith.constant 0 : i32
    %c0_i32_1 = arith.constant 0 : i32
    return %arg0, %c0_i32, %c0_i32_0 : i32, i32, i32
  }
  func.func @transform_3(%arg0: i32) -> (i32, i32, i32) {
    %c0_i32 = arith.constant 0 : i32
    %c0_i32_0 = arith.constant 0 : i32
    %c0_i32_1 = arith.constant 0 : i32
    %c0_i32_2 = arith.constant 0 : i32
    return %c0_i32, %c0_i32_0, %c0_i32_1 : i32, i32, i32
  }
  func.func @transform_4(%arg0: i32) -> (i32, i32) {
    %c0_i32 = arith.constant 0 : i32
    %c0_i32_0 = arith.constant 0 : i32
    %c0_i32_1 = arith.constant 0 : i32
    return %c0_i32, %c0_i32_0 : i32, i32
  }
  func.func @transform_5(%arg0: i32) -> (i32, i32) {
    %c0_i32 = arith.constant 0 : i32
    %c0_i32_0 = arith.constant 0 : i32
    %c0_i32_1 = arith.constant 0 : i32
    return %c0_i32, %c0_i32_0 : i32, i32
  }
}

module attributes {stable_mosaic.version = 11 : i64} {
  func.func @fc_kernel(%arg0: i32, %arg1: memref<8x32xf32, #tpu.memory_space<vmem>>, %arg2: memref<32x128xf32, #tpu.memory_space<vmem>>, %arg3: memref<1x128xf32, #tpu.memory_space<vmem>>, %arg4: memref<8x128xf32, #tpu.memory_space<vmem>>) attributes {dimension_semantics = [#tpu.dimension_semantics<parallel>], iteration_bounds = array<i64: 1>, scalar_prefetch = 0 : i64, scratch_operands = 0 : i64, tpu.core_type = #tpu.core_type<tc>, window_params = [{pipeline_mode = #tpu.pipeline_mode<synchronous>, transform_indices = @transform_0, window_bounds = array<i64: 8, 32>}, {transform_indices = @transform_1, window_bounds = array<i64: 32, 128>}, {transform_indices = @transform_2, window_bounds = array<i64: 1, 128>}, {transform_indices = @transform_3, window_bounds = array<i64: 8, 128>}]} {
    %c0 = arith.constant 0 : index
    %c0_0 = arith.constant 0 : index
    %0 = vector.load %arg1[%c0, %c0_0] : memref<8x32xf32, #tpu.memory_space<vmem>>, vector<8x32xf32>
    %c0_1 = arith.constant 0 : index
    %c0_2 = arith.constant 0 : index
    %1 = vector.load %arg2[%c0_1, %c0_2] : memref<32x128xf32, #tpu.memory_space<vmem>>, vector<32x128xf32>
    %cst = arith.constant dense<0.000000e+00> : vector<8x128xf32>
    %2 = tpu.matmul %0, %1, %cst {dimension_numbers = #tpu.dot_dimension_numbers<[1], [0], [0], [1], [0, 0, 1, 1], [], []>} : vector<8x32xf32>, vector<32x128xf32>, vector<8x128xf32> -> vector<8x128xf32>
    %c0_3 = arith.constant 0 : index
    %c0_4 = arith.constant 0 : index
    %3 = vector.load %arg3[%c0_3, %c0_4] : memref<1x128xf32, #tpu.memory_space<vmem>>, vector<1x128xf32>
    %4 = vector.broadcast %3 : vector<1x128xf32> to vector<8x128xf32>
    %5 = arith.addf %2, %4 : vector<8x128xf32>
    %c0_5 = arith.constant 0 : index
    %c0_6 = arith.constant 0 : index
    %6 = vector.load %arg4[%c0_5, %c0_6] : memref<8x128xf32, #tpu.memory_space<vmem>>, vector<8x128xf32>
    tpu.vector_store %arg4[%c0_5, %c0_6], %5 {strides = array<i32>} : memref<8x128xf32, #tpu.memory_space<vmem>>, vector<8x128xf32>,
    return
  }
  func.func @transform_0(%arg0: i32) -> (i32, i32) {
    %c0_i32 = arith.constant 0 : i32
    %c0_i32_0 = arith.constant 0 : i32
    %c0_i32_1 = arith.constant 0 : i32
    return %c0_i32, %c0_i32_0 : i32, i32
  }
  func.func @transform_1(%arg0: i32) -> (i32, i32) {
    %c0_i32 = arith.constant 0 : i32
    %c0_i32_0 = arith.constant 0 : i32
    return %c0_i32, %arg0 : i32, i32
  }
  func.func @transform_2(%arg0: i32) -> (i32, i32) {
    %c0_i32 = arith.constant 0 : i32
    %c0_i32_0 = arith.constant 0 : i32
    return %c0_i32, %arg0 : i32, i32
  }
  func.func @transform_3(%arg0: i32) -> (i32, i32) {
    %c0_i32 = arith.constant 0 : i32
    %c0_i32_0 = arith.constant 0 : i32
    return %c0_i32, %arg0 : i32, i32
  }
}

</mosaic_0001>

<bundles_post_ra>
// kernel: text_generator_forward.3
= control target key start
LH: loop header
LB: loop body
LE: loop exit
PB: predicated region body
PF: predicated region fallthrough
CT: control target
= control target key end

     0   :  { %vm36_vm0 = vcmask 261120   ;;  %s818_s1 = inlined_call_operand.vmem [shape: f32[3,32,32], index: 1, kind: input, shape index: {}]   ;;  %s819_s0 = inlined_call_operand.vmem [shape: f32[64,32], index: 0, kind: input, shape index: {}]   ;;  %s820_s2 = inlined_call_operand.vmem [shape: f32[3,1,32], index: 2, kind: input, shape index: {}]   ;;  %s821_s3 = inlined_call_operand.vmem [shape: f32[64,32], index: 3, kind: output, shape index: {0}]   ;;  %s822_s4 = inlined_call_operand.vmem [shape: f32[64,32], index: 4, kind: output, shape index: {1}]   ;;  %s823_s5 = inlined_call_operand.vmem [shape: f32[64,32], index: 5, kind: output, shape index: {2}]  }
   0x1   :  { %v25_v0 = vld [vmem:[%s818_s1] sm:$0xff]  ;;  %v26_v1 = vld [vmem:[%s818_s1 + $0x8] sm:$0xff]  ;;  %v27_v2 = vld [vmem:[%s818_s1 + $0x10] sm:$0xff] }
   0x2   :  { %v571_v3 = vpack.c.bf16 %v26_v1, %v25_v0  ;;  %v28_v4 = vld [vmem:[%s818_s1 + $0x18] sm:$0xff]  ;;  %v17_v5 = vld [vmem:[%s819_s0] sm:$0xff]  ;;  %v448_v9 = vld [vmem:[%s818_s1 + $0x28] sm:$0xff] }
   0x3   :  { %v21_v6 = vld [vmem:[%s819_s0 + $0x20] sm:$0xff]  ;;  %v575_v7 = vpack.c.bf16 %v28_v4, %v27_v2  ;;  %519 = vmatprep.mubr.msk.f32.mxu0 %vm36_vm0, %v17_v5  ;;  %v462_v11 = vld [vmem:[%s818_s1 + $0x48] sm:$0xff]  ;;  %v449_v14 = vld [vmem:[%s818_s1 + $0x30] sm:$0xff] }
   0x4   :  { %525 = vmatprep.mubr.msk.f32.mxu1 %vm36_vm0, %v21_v6  ;;  %v447_v8 = vld [vmem:[%s818_s1 + $0x20] sm:$0xff]  ;;  %572 = vmatprep.subr.bf16.mxu0 %v571_v3  ;;  %v450_v15 = vld [vmem:[%s818_s1 + $0x38] sm:$0xff]  ;;  %v463_v16 = vld [vmem:[%s818_s1 + $0x50] sm:$0xff] }
   0x5   :  { %595 = vmatprep.subr.bf16.mxu1 %v571_v3  ;;  %v461_v10 = vld [vmem:[%s818_s1 + $0x40] sm:$0xff]  ;;  %574 = vmatpush3.bf16.msra.mxu0 %v571_v3  ;;  %v579_v12 = vpack.c.bf16 %v448_v9, %v447_v8  ;;  %v464_v17 = vld [vmem:[%s818_s1 + $0x58] sm:$0xff]  ;;  %v18_v18 = vld [vmem:[%s819_s0 + $0x8] sm:$0xff]  ;;  %v583_v22 = vpack.c.bf16 %v450_v15, %v449_v14 }
   0x6   :  { %597 = vmatpush3.bf16.msra.mxu1 %v571_v3  ;;  %576 = vmatprep.subr.bf16.mxu0 %v575_v7  ;;  %v587_v13 = vpack.c.bf16 %v462_v11, %v461_v10  ;;  %v22_v19 = vld [vmem:[%s819_s0 + $0x28] sm:$0xff]  ;;  %v19_v20 = vld [vmem:[%s819_s0 + $0x10] sm:$0xff]  ;;  %v591_v23 = vpack.c.bf16 %v464_v17, %v463_v16  ;;  %v20_v24 = vld [vmem:[%s819_s0 + $0x18] sm:$0xff] }
   0x7   :  { %596 = vmatprep.subr.bf16.mxu1 %v575_v7  ;;  %v23_v21 = vld [vmem:[%s819_s0 + $0x30] sm:$0xff]  ;;  %v24_v25 = vld [vmem:[%s819_s0 + $0x38] sm:$0xff]  ;;  %v438_v26 = vld [vmem:[%s820_s2] ss:$0 sm:$0xff] }
   0x8   :  { %v452_v43 = vld [vmem:[%s820_s2 + $0x1] ss:$0 sm:$0xff]  ;;  %v466_v44 = vld [vmem:[%s820_s2 + $0x2] ss:$0 sm:$0xff] }
   0x9   :  { %578 = vmatpush3.bf16.msra.mxu0 %v575_v7 }
   0xa   :  { %598 = vmatpush3.bf16.msra.mxu1 %v575_v7  ;;  %588 = vmatprep.subr.bf16.mxu0 %v587_v13 }
   0xb   :  { %580 = vmatprep.subr.bf16.mxu1 %v579_v12 }
   0xc   :  { %520 = vmatmul.mubr.msk.f32.vlgmr.msra.gmra.mrb[0].mxu0 %vm36_vm0, %v18_v18 }
   0xd   :  { %526 = vmatmul.mubr.msk.f32.vlgmr.msra.gmra.mrb[0].mxu1 %vm36_vm0, %v22_v19  ;;  %590 = vmatpush3.bf16.msra.mxu0 %v587_v13 }
   0xe   :  { %582 = vmatpush3.bf16.msra.mxu1 %v579_v12  ;;  %522 = vmatprep.mubr.msk.f32.mxu0 %vm36_vm0, %v19_v20 }
   0xf   :  { %528 = vmatprep.mubr.msk.f32.mxu1 %vm36_vm0, %v23_v21  ;;  %584 = vmatprep.subr.bf16.mxu1 %v583_v22 }
  0x10   :  { %592 = vmatprep.subr.bf16.mxu0 %v591_v23  ;;  %523 = vmatmul.mubr.msk.f32.gmra.mrb[2].mxu0 %vm36_vm0, %v20_v24 }
  0x11   :  { %529 = vmatmul.mubr.msk.f32.gmra.mrb[2].mxu1 %vm36_vm0, %v24_v25  ;;  %594 = vmatpush3.bf16.msra.mxu0 %v591_v23 }
  0x12   :  { %586 = vmatpush3.bf16.msra.mxu1 %v583_v22  ;;  %539 = vmatprep.mubr.msk.f32.mxu1 %vm36_vm0, %v17_v5 }
  0x13   :  { %559 = vmatprep.mubr.msk.f32.mxu0 %vm36_vm0, %v17_v5 }
  0x14   :  { %560 = vmatmul.mubr.msk.f32.vlgmr.msra.gmra.mrb[4].mxu0 %vm36_vm0, %v18_v18 }
  0x15   :  { %540 = vmatmul.mubr.msk.f32.vlgmr.msra.gmra.mrb[4].mxu1 %vm36_vm0, %v18_v18  ;;  %562 = vmatprep.mubr.msk.f32.mxu0 %vm36_vm0, %v19_v20 }
  0x16   :  { %542 = vmatprep.mubr.msk.f32.mxu1 %vm36_vm0, %v19_v20 }
  0x18   :  { %563 = vmatmul.mubr.msk.f32.gmra.mrb[6].mxu0 %vm36_vm0, %v20_v24 }
  0x19   :  { %543 = vmatmul.mubr.msk.f32.gmra.mrb[6].mxu1 %vm36_vm0, %v20_v24  ;;  %565 = vmatprep.mubr.msk.f32.mxu0 %vm36_vm0, %v21_v6 }
  0x1a   :  { %545 = vmatprep.mubr.msk.f32.mxu1 %vm36_vm0, %v21_v6 }
  0x1c   :  { %566 = vmatmul.mubr.msk.f32.gmra.mrb[8].mxu0 %vm36_vm0, %v22_v19 }
  0x1d   :  { %546 = vmatmul.mubr.msk.f32.gmra.mrb[8].mxu1 %vm36_vm0, %v22_v19  ;;  %568 = vmatprep.mubr.msk.f32.mxu0 %vm36_vm0, %v23_v21 }
  0x1e   :  { %548 = vmatprep.mubr.msk.f32.mxu1 %vm36_vm0, %v23_v21 }
  0x20   :  { %569 = vmatmul.mubr.msk.f32.gmra.mrb[10].mxu0 %vm36_vm0, %v24_v25 }
  0x21   :  { %549 = vmatmul.mubr.msk.f32.gmra.mrb[10].mxu1 %vm36_vm0, %v24_v25 }
  0xdf   :  { %v521_v27 = vpop.f32.mrb[0].mxu0 }
  0xe0   :  { %v527_v28 = vpop.f32.mrb[0].mxu1  ;;  %v133_v29 = vadd.f32 %v521_v27, %v438_v26  ;;  %v127_v31 = vpop.f32.mrb[1].mxu0 }
  0xe1   :  { %v153_v30 = vadd.f32 %v527_v28, %v438_v26  ;;  %v147_v32 = vpop.f32.mrb[1].mxu1  ;;  %v128_v33 = vadd.f32 %v438_v26, %v127_v31 }
  0xe2   :  { %v148_v34 = vadd.f32 %v438_v26, %v147_v32  ;;  %167 = vst.msk [vmem:[%s821_s3 + $0x8] sm:$0xff] %vm36_vm0, %v133_v29 }
  0xe3   :  { %171 = vst.msk [vmem:[%s821_s3 + $0x28] sm:$0xff] %vm36_vm0, %v153_v30  ;;  %166 = vst.msk [vmem:[%s821_s3] sm:$0xff] %vm36_vm0, %v128_v33  ;;  %v524_v35 = vpop.f32.mrb[2].mxu0 }
  0xe4   :  { %170 = vst.msk [vmem:[%s821_s3 + $0x20] sm:$0xff] %vm36_vm0, %v148_v34  ;;  %v530_v36 = vpop.f32.mrb[2].mxu1  ;;  %v143_v37 = vadd.f32 %v524_v35, %v438_v26  ;;  %v137_v39 = vpop.f32.mrb[3].mxu0 }
  0xe5   :  { %v163_v38 = vadd.f32 %v530_v36, %v438_v26  ;;  %v157_v40 = vpop.f32.mrb[3].mxu1  ;;  %v138_v41 = vadd.f32 %v438_v26, %v137_v39 }
  0xe6   :  { %v158_v42 = vadd.f32 %v438_v26, %v157_v40  ;;  %169 = vst.msk [vmem:[%s821_s3 + $0x18] sm:$0xff] %vm36_vm0, %v143_v37 }
  0xe7   :  { %173 = vst.msk [vmem:[%s821_s3 + $0x38] sm:$0xff] %vm36_vm0, %v163_v38  ;;  %168 = vst.msk [vmem:[%s821_s3 + $0x10] sm:$0xff] %vm36_vm0, %v138_v41  ;;  %v561_v46 = vpop.f32.mrb[4].mxu0 }
  0xe8   :  { %172 = vst.msk [vmem:[%s821_s3 + $0x30] sm:$0xff] %vm36_vm0, %v158_v42  ;;  %v541_v45 = vpop.f32.mrb[4].mxu1  ;;  %v385_v48 = vadd.f32 %v561_v46, %v466_v44  ;;  %v379_v50 = vpop.f32.mrb[5].mxu0 }
  0xe9   :  { %v259_v47 = vadd.f32 %v541_v45, %v452_v43  ;;  %v253_v49 = vpop.f32.mrb[5].mxu1  ;;  %v380_v52 = vadd.f32 %v466_v44, %v379_v50 }
  0xea   :  { %v254_v51 = vadd.f32 %v452_v43, %v253_v49  ;;  %419 = vst.msk [vmem:[%s823_s5 + $0x8] sm:$0xff] %vm36_vm0, %v385_v48 }
  0xeb   :  { %293 = vst.msk [vmem:[%s822_s4 + $0x8] sm:$0xff] %vm36_vm0, %v259_v47  ;;  %418 = vst.msk [vmem:[%s823_s5] sm:$0xff] %vm36_vm0, %v380_v52  ;;  %v564_v54 = vpop.f32.mrb[6].mxu0 }
  0xec   :  { %292 = vst.msk [vmem:[%s822_s4] sm:$0xff] %vm36_vm0, %v254_v51  ;;  %v544_v53 = vpop.f32.mrb[6].mxu1  ;;  %v395_v56 = vadd.f32 %v564_v54, %v466_v44  ;;  %v389_v58 = vpop.f32.mrb[7].mxu0 }
  0xed   :  { %v269_v55 = vadd.f32 %v544_v53, %v452_v43  ;;  %v263_v57 = vpop.f32.mrb[7].mxu1  ;;  %v390_v60 = vadd.f32 %v466_v44, %v389_v58 }
  0xee   :  { %v264_v59 = vadd.f32 %v452_v43, %v263_v57  ;;  %421 = vst.msk [vmem:[%s823_s5 + $0x18] sm:$0xff] %vm36_vm0, %v395_v56 }
  0xef   :  { %295 = vst.msk [vmem:[%s822_s4 + $0x18] sm:$0xff] %vm36_vm0, %v269_v55  ;;  %420 = vst.msk [vmem:[%s823_s5 + $0x10] sm:$0xff] %vm36_vm0, %v390_v60  ;;  %v567_v62 = vpop.f32.mrb[8].mxu0 }
  0xf0   :  { %294 = vst.msk [vmem:[%s822_s4 + $0x10] sm:$0xff] %vm36_vm0, %v264_v59  ;;  %v547_v61 = vpop.f32.mrb[8].mxu1  ;;  %v405_v0 = vadd.f32 %v567_v62, %v466_v44  ;;  %v399_v2 = vpop.f32.mrb[9].mxu0 }
  0xf1   :  { %v279_v63 = vadd.f32 %v547_v61, %v452_v43  ;;  %v273_v1 = vpop.f32.mrb[9].mxu1  ;;  %v400_v4 = vadd.f32 %v466_v44, %v399_v2 }
  0xf2   :  { %v274_v3 = vadd.f32 %v452_v43, %v273_v1  ;;  %423 = vst.msk [vmem:[%s823_s5 + $0x28] sm:$0xff] %vm36_vm0, %v405_v0 }
  0xf3   :  { %297 = vst.msk [vmem:[%s822_s4 + $0x28] sm:$0xff] %vm36_vm0, %v279_v63  ;;  %422 = vst.msk [vmem:[%s823_s5 + $0x20] sm:$0xff] %vm36_vm0, %v400_v4  ;;  %v570_v6 = vpop.f32.mrb[10].mxu0 }
  0xf4   :  { %296 = vst.msk [vmem:[%s822_s4 + $0x20] sm:$0xff] %vm36_vm0, %v274_v3  ;;  %v550_v5 = vpop.f32.mrb[10].mxu1  ;;  %v415_v8 = vadd.f32 %v570_v6, %v466_v44  ;;  %v409_v10 = vpop.f32.mrb[11].mxu0 }
  0xf5   :  { %v289_v7 = vadd.f32 %v550_v5, %v452_v43  ;;  %v283_v9 = vpop.f32.mrb[11].mxu1  ;;  %v410_v12 = vadd.f32 %v466_v44, %v409_v10 }
  0xf6   :  { %v284_v11 = vadd.f32 %v452_v43, %v283_v9  ;;  %425 = vst.msk [vmem:[%s823_s5 + $0x38] sm:$0xff] %vm36_vm0, %v415_v8 }
  0xf7   :  { %299 = vst.msk [vmem:[%s822_s4 + $0x38] sm:$0xff] %vm36_vm0, %v289_v7  ;;  %424 = vst.msk [vmem:[%s823_s5 + $0x30] sm:$0xff] %vm36_vm0, %v410_v12 }
  0xf8   :  { %298 = vst.msk [vmem:[%s822_s4 + $0x30] sm:$0xff] %vm36_vm0, %v284_v11 }

// kernel: text_generator_forward.5
= control target key start
LH: loop header
LB: loop body
LE: loop exit
PB: predicated region body
PF: predicated region fallthrough
CT: control target
= control target key end

     0   :  { %v132_v0 = vmov 0.0|0.0   ;;  %vm133_vm0 = vmmov 0   ;;  %v134_v4 = vmov 0.0   ;;  %vm26_vm1 = vcmask 261120   ;;  %s176_s1 = inlined_call_operand.vmem [shape: f32[32,128], index: 1, kind: input, shape index: {}]   ;;  %s177_s0 = inlined_call_operand.vmem [shape: f32[8,32], index: 0, kind: input, shape index: {}]   ;;  %s178_s2 = inlined_call_operand.vmem [shape: f32[1,128], index: 2, kind: input, shape index: {}]   ;;  %s179_s3 = inlined_call_operand.vmem [shape: f32[8,128], index: 3, kind: output, shape index: {}]  }
   0x1   :  { %123 = vmatprep.subr.bf16.mxu0 %v132_v0  ;;  %v15_v1 = vld [vmem:[%s176_s1] sm:$0xff]  ;;  %v16_v2 = vld [vmem:[%s176_s1 + $0x8] sm:$0xff]  ;;  %v17_v3 = vld [vmem:[%s176_s1 + $0x10] sm:$0xff]  ;;  %120 = vmatprep.mubr.msk.f32.mxu0 %vm133_vm0, %v134_v4 }
   0x2   :  { %v124_v5 = vpack.c.bf16 %v16_v2, %v15_v1  ;;  %v18_v6 = vld [vmem:[%s176_s1 + $0x18] sm:$0xff]  ;;  %v14_v8 = vld [vmem:[%s177_s0] sm:$0xff] }
   0x3   :  { %v127_v7 = vpack.c.bf16 %v18_v6, %v17_v3  ;;  %v105_v9 = vld [vmem:[%s178_s2] ss:$0 sm:$0xff] }
   0x4   :  { %125 = vmatpush3.bf16.msra.mxu0 %v124_v5 }
   0x5   :  { %126 = vmatprep.subr.bf16.mxu0 %v132_v0 }
   0x8   :  { %128 = vmatpush3.bf16.msra.mxu0 %v127_v7 }
   0xb   :  { %121 = vmatmul.mubr.msk.f32.vlgmr.msra.gmra.mrb[0].mxu0 %vm26_vm1, %v14_v8 }
  0xde   :  { %v96_v10 = vpop.f32.mrb[0].mxu0 }
  0xdf   :  { %v97_v11 = vadd.f32 %v105_v9, %v96_v10  ;;  %v122_v12 = vpop.f32.mrb[1].mxu0 }
  0xe1   :  { %100 = vst [vmem:[%s179_s3] sm:$0xff] %v97_v11 }

// kernel: text_generator_forward.4
= control target key start
LH: loop header
LB: loop body
LE: loop exit
PB: predicated region body
PF: predicated region fallthrough
CT: control target
= control target key end

     0   :  { %vm24_vm0 = vcmask 261120   ;;  %v2657_v0 = vmov 0.0|0.0   ;;  %vm2658_vm1 = vmmov 0   ;;  %v2659_v4 = vmov 0.0   ;;  %s2998_s3 = inlined_call_operand.vmem [shape: f32[3,32,32], index: 3, kind: input, shape index: {}]   ;;  %s2999_s0 = inlined_call_operand.vmem [shape: f32[8,8,32], index: 0, kind: input, shape index: {}]   ;;  %s3000_s1 = inlined_call_operand.vmem [shape: f32[8,8,32], index: 1, kind: input, shape index: {}]   ;;  %s3001_s4 = inlined_call_operand.vmem [shape: f32[1,32], index: 4, kind: input, shape index: {}]   ;;  %s3002_s2 = inlined_call_operand.vmem [shape: f32[8,8,32], index: 2, kind: input, shape index: {}]   ;;  %s3003_s5 = inlined_call_operand.vmem [shape: f32[8,32], index: 5, kind: output, shape index: {}]  }
   0x1   :  { %2430 = vmatprep.subr.bf16.mxu0 %v2657_v0  ;;  %v26_v1 = vld [vmem:[%s2998_s3] sm:$0xff]  ;;  %v27_v2 = vld [vmem:[%s2998_s3 + $0x8] sm:$0xff]  ;;  %v28_v3 = vld [vmem:[%s2998_s3 + $0x10] sm:$0xff]  ;;  %2174 = vmatprep.mubr.msk.f32.mxu0 %vm2658_vm1, %v2659_v4  ;;  %25 = vst.msk [vmem:[#allocation2] sm:$0xff] %vm24_vm0, %v2659_v4 }
   0x2   :  { %v2704_v5 = vpack.c.bf16 %v27_v2, %v26_v1  ;;  %v29_v6 = vld [vmem:[%s2998_s3 + $0x18] sm:$0xff]  ;;  %2436 = vmatprep.subr.bf16.mxu1 %v2657_v0  ;;  %v1976_v7 = vld [vmem:[%s2998_s3 + $0x20] sm:$0xff]  ;;  %v1977_v8 = vld [vmem:[%s2998_s3 + $0x28] sm:$0xff]  ;;  %2185 = vmatprep.mubr.msk.f32.mxu1 %vm2658_vm1, %v2659_v4 }
   0x3   :  { %v2718_v9 = vpack.c.bf16 %v1977_v8, %v1976_v7  ;;  %v1978_v10 = vld [vmem:[%s2998_s3 + $0x30] sm:$0xff]  ;;  %v1979_v11 = vld [vmem:[%s2998_s3 + $0x38] sm:$0xff]  ;;  %v2727_v12 = vpack.c.bf16 %v29_v6, %v28_v3  ;;  %v1980_v14 = vld [vmem:[%s2998_s3 + $0x40] sm:$0xff] }
   0x4   :  { %2432 = vmatpush3.bf16.msra.mxu0 %v2704_v5  ;;  %v2731_v13 = vpack.c.bf16 %v1979_v11, %v1978_v10  ;;  %v1981_v15 = vld [vmem:[%s2998_s3 + $0x48] sm:$0xff]  ;;  %v1982_v18 = vld [vmem:[%s2998_s3 + $0x50] sm:$0xff]  ;;  %v1983_v19 = vld [vmem:[%s2998_s3 + $0x58] sm:$0xff] }
   0x5   :  { %2433 = vmatprep.subr.bf16.mxu0 %v2657_v0  ;;  %2438 = vmatpush3.bf16.msra.mxu1 %v2718_v9  ;;  %v2741_v17 = vpack.c.bf16 %v1981_v15, %v1980_v14  ;;  %v2755_v20 = vpack.c.bf16 %v1983_v19, %v1982_v18  ;;  %v262_v21 = vld [vmem:[%s2999_s0] sm:$0xff]  ;;  %v1993_v49 = vld [vmem:[%s2999_s0 + $0x8] sm:$0xff]  ;;  %v2001_v19 = vld [vmem:[%s2999_s0 + $0x10] sm:$0xff] }
   0x6   :  { %2439 = vmatprep.subr.bf16.mxu1 %v2657_v0  ;;  %v270_v22 = vld [vmem:[%s3000_s1] sm:$0xff]  ;;  %v1995_v53 = vld [vmem:[%s3000_s1 + $0x8] sm:$0xff] }
   0x7   :  { %v2784_v36 = vld [vmem:[%s3001_s4] ss:$0 sm:$0xff]  ;;  %v1997_v6 = vld [vmem:[%s3002_s2 + $0x8] sm:$0xff] }
   0x8   :  { %2435 = vmatpush3.bf16.msra.mxu0 %v2727_v12  ;;  %v47_v16 = vld [vmem:[#allocation2] sm:$0xff] }
   0x9   :  { %2441 = vmatpush3.bf16.msra.mxu1 %v2731_v13  ;;  %2442 = vmatprep.subr.bf16.mxu0 %v2657_v0  ;;  %v278_v40 = vld [vmem:[%s3002_s2] sm:$0xff] }
   0xa   :  { %2448 = vmatprep.subr.bf16.mxu1 %v2657_v0 }
   0xb   :  { %2175 = vmatmul.mubr.msk.f32.vlgmr.msra.gmra.mrb[0].mxu0 %vm24_vm0, %v47_v16 }
   0xc   :  { %2186 = vmatmul.mubr.msk.f32.vlgmr.msra.gmra.mrb[0].mxu1 %vm24_vm0, %v47_v16  ;;  %2444 = vmatpush3.bf16.msra.mxu0 %v2741_v17 }
   0xd   :  { %2445 = vmatprep.subr.bf16.mxu0 %v2657_v0  ;;  %2196 = vmatprep.mubr.msk.f32.mxu0 %vm2658_vm1, %v2659_v4 }
   0xe   :  { %2450 = vmatpush3.bf16.msra.mxu1 %v2704_v5  ;;  %2207 = vmatprep.mubr.msk.f32.mxu1 %vm2658_vm1, %v2659_v4 }
   0xf   :  { %2451 = vmatprep.subr.bf16.mxu1 %v2657_v0 }
  0x10   :  { %2447 = vmatpush3.bf16.msra.mxu0 %v2755_v20 }
  0x11   :  { %2454 = vmatprep.subr.bf16.mxu0 %v2657_v0 }
  0x12   :  { %2453 = vmatpush3.bf16.msra.mxu1 %v2727_v12 }
  0x13   :  { %2197 = vmatmul.mubr.msk.f32.vlgmr.msra.gmra.mrb[2].mxu0 %vm24_vm0, %v47_v16  ;;  %2460 = vmatprep.subr.bf16.mxu1 %v2657_v0 }
  0x14   :  { %2456 = vmatpush3.bf16.msra.mxu0 %v2718_v9  ;;  %2218 = vmatprep.mubr.msk.f32.mxu0 %vm2658_vm1, %v2659_v4 }
  0x15   :  { %2457 = vmatprep.subr.bf16.mxu0 %v2657_v0 }
  0x18   :  { %2459 = vmatpush3.bf16.msra.mxu0 %v2731_v13 }
  0x19   :  { %2466 = vmatprep.subr.bf16.mxu0 %v2657_v0 }
  0xde   :  { %v118_v23 = vpop.f32.mrb[0].mxu0 }
  0xdf   :  { %v263_v24 = vadd.f32 %v262_v21, %v118_v23  ;;  %v2176_v25 = vpop.f32.mrb[1].mxu0  ;;  %v188_v26 = vpop.f32.mrb[0].mxu1 }
  0xe0   :  { %v271_v27 = vadd.f32 %v270_v22, %v188_v26  ;;  %v2187_v28 = vpop.f32.mrb[1].mxu1 }
  0xe1   :  { %v1988_v29 = vmul.f32 -1.442695, %v263_v24  ;;  %v2003_v24 = vld [vmem:[%s3000_s1 + $0x10] sm:$0xff] }
  0xe2   :  { %v1989_v30 = vmul.f32 -1.442695, %v271_v27 }
  0xe3   :  { %2577 = vpow2.f32 %v1988_v29 }
  0xe4   :  { %2579 = vpow2.f32 %v1989_v30 }
  0xe6   :  { %v258_v31 = vpop.f32.mrb[2].mxu0 }
  0xe7   :  { %v2198_v32 = vpop.f32.mrb[3].mxu0  ;;  %v259_v38 = vadd.f32 %v2784_v36, %v258_v31 }
  0xed   :  { %v2578_v33 = vpop.eup %2577 }
  0xee   :  { %v267_v34 = vadd.f32 1.0, %v2578_v33  ;;  %v2580_v35 = vpop.eup %2579 }
  0xef   :  { %v275_v37 = vadd.f32 1.0, %v2580_v35 }
  0xf0   :  { %2581 = vrcp.f32 %v267_v34 }
  0xf1   :  { %2583 = vrcp.f32 %v275_v37 }
  0xfa   :  { %v2582_v39 = vpop.eup %2581 }
  0xfb   :  { %v279_v41 = vmul.f32 %v2582_v39, %v259_v38  ;;  %v2584_v43 = vpop.eup %2583  ;;  %v2005_v39 = vld [vmem:[%s3002_s2 + $0x10] sm:$0xff] }
  0xfc   :  { %v282_v44 = vsub.f32 1.0, %v2584_v43  ;;  %v284_v47 = vmul.f32 %v2584_v43, %v47_v16 }
  0xfd   :  { %v280_v42 = vadd.f32 %v279_v41, %v278_v40 }
  0xff   :  { %2585 = vtanh.f32 %v280_v42 }
 0x109   :  { %v2586_v45 = vpop.eup %2585 }
 0x10a   :  { %v283_v46 = vmul.f32 %v2586_v45, %v282_v44 }
 0x10c   :  { %v285_v48 = vadd.f32 %v284_v47, %v283_v46 }
 0x10e   :  { %2208 = vmatmul.mubr.msk.f32.vlgmr.msra.gmra.mrb[2].mxu1 %vm24_vm0, %v285_v48  ;;  %2219 = vmatmul.mubr.msk.f32.vlgmr.msra.gmra.mrb[4].mxu0 %vm24_vm0, %v285_v48 }
 0x10f   :  { %2462 = vmatpush3.bf16.msra.mxu1 %v2741_v17  ;;  %2229 = vmatprep.mubr.msk.f32.mxu1 %vm2658_vm1, %v2659_v4 }
 0x110   :  { %2463 = vmatprep.subr.bf16.mxu1 %v2657_v0  ;;  %2468 = vmatpush3.bf16.msra.mxu0 %v2704_v5 }
 0x111   :  { %2469 = vmatprep.subr.bf16.mxu0 %v2657_v0  ;;  %2240 = vmatprep.mubr.msk.f32.mxu0 %vm2658_vm1, %v2659_v4 }
 0x113   :  { %2465 = vmatpush3.bf16.msra.mxu1 %v2755_v20 }
 0x114   :  { %2472 = vmatprep.subr.bf16.mxu1 %v2657_v0  ;;  %2471 = vmatpush3.bf16.msra.mxu0 %v2727_v12 }
 0x115   :  { %2478 = vmatprep.subr.bf16.mxu0 %v2657_v0 }
 0x116   :  { %2230 = vmatmul.mubr.msk.f32.vlgmr.msra.gmra.mrb[4].mxu1 %vm24_vm0, %v285_v48 }
 0x117   :  { %2474 = vmatpush3.bf16.msra.mxu1 %v2718_v9  ;;  %2251 = vmatprep.mubr.msk.f32.mxu1 %vm2658_vm1, %v2659_v4 }
 0x118   :  { %2475 = vmatprep.subr.bf16.mxu1 %v2657_v0 }
 0x11b   :  { %2477 = vmatpush3.bf16.msra.mxu1 %v2731_v13 }
 0x11c   :  { %2484 = vmatprep.subr.bf16.mxu1 %v2657_v0 }
 0x1e1   :  { %v355_v50 = vpop.f32.mrb[2].mxu1  ;;  %v425_v51 = vpop.f32.mrb[4].mxu0 }
 0x1e2   :  { %v501_v52 = vadd.f32 %v1993_v49, %v355_v50  ;;  %v2209_v54 = vpop.f32.mrb[3].mxu1  ;;  %v2220_v55 = vpop.f32.mrb[5].mxu0  ;;  %v510_v57 = vadd.f32 %v1995_v53, %v425_v51 }
 0x1e4   :  { %v1994_v56 = vmul.f32 -1.442695, %v501_v52  ;;  %v1996_v58 = vmul.f32 -1.442695, %v510_v57  ;;  %v2011_v52 = vld [vmem:[%s3000_s1 + $0x18] sm:$0xff] }
 0x1e6   :  { %2587 = vpow2.f32 %v1994_v56 }
 0x1e7   :  { %2589 = vpow2.f32 %v1996_v58 }
 0x1e9   :  { %v495_v59 = vpop.f32.mrb[4].mxu1 }
 0x1ea   :  { %v2231_v60 = vpop.f32.mrb[5].mxu1  ;;  %v496_v2 = vadd.f32 %v2784_v36, %v495_v59 }
 0x1f0   :  { %v2588_v61 = vpop.eup %2587 }
 0x1f1   :  { %v505_v62 = vadd.f32 1.0, %v2588_v61  ;;  %v2590_v63 = vpop.eup %2589 }
 0x1f2   :  { %v514_v1 = vadd.f32 1.0, %v2590_v63 }
 0x1f3   :  { %2591 = vrcp.f32 %v505_v62 }
 0x1f4   :  { %2593 = vrcp.f32 %v514_v1 }
 0x1fd   :  { %v2592_v3 = vpop.eup %2591 }
 0x1fe   :  { %v519_v7 = vmul.f32 %v2592_v3, %v496_v2  ;;  %v2594_v10 = vpop.eup %2593  ;;  %v2013_v3 = vld [vmem:[%s3002_s2 + $0x18] sm:$0xff] }
 0x1ff   :  { %v522_v11 = vsub.f32 1.0, %v2594_v10  ;;  %v524_v16 = vmul.f32 %v2594_v10, %v285_v48  ;;  %v2009_v48 = vld [vmem:[%s2999_s0 + $0x18] sm:$0xff] }
 0x200   :  { %v520_v8 = vadd.f32 %v1997_v6, %v519_v7 }
 0x202   :  { %2595 = vtanh.f32 %v520_v8 }
 0x20c   :  { %v2596_v14 = vpop.eup %2595 }
 0x20d   :  { %v523_v15 = vmul.f32 %v2596_v14, %v522_v11 }
 0x20f   :  { %v525_v18 = vadd.f32 %v524_v16, %v523_v15 }
 0x211   :  { %2241 = vmatmul.mubr.msk.f32.vlgmr.msra.gmra.mrb[6].mxu0 %vm24_vm0, %v525_v18  ;;  %2252 = vmatmul.mubr.msk.f32.vlgmr.msra.gmra.mrb[6].mxu1 %vm24_vm0, %v525_v18 }
 0x212   :  { %2480 = vmatpush3.bf16.msra.mxu0 %v2741_v17  ;;  %2262 = vmatprep.mubr.msk.f32.mxu0 %vm2658_vm1, %v2659_v4 }
 0x213   :  { %2481 = vmatprep.subr.bf16.mxu0 %v2657_v0  ;;  %2486 = vmatpush3.bf16.msra.mxu1 %v2704_v5 }
 0x214   :  { %2487 = vmatprep.subr.bf16.mxu1 %v2657_v0  ;;  %2273 = vmatprep.mubr.msk.f32.mxu1 %vm2658_vm1, %v2659_v4 }
 0x216   :  { %2483 = vmatpush3.bf16.msra.mxu0 %v2755_v20 }
 0x217   :  { %2490 = vmatprep.subr.bf16.mxu0 %v2657_v0  ;;  %2489 = vmatpush3.bf16.msra.mxu1 %v2727_v12 }
 0x218   :  { %2496 = vmatprep.subr.bf16.mxu1 %v2657_v0 }
 0x219   :  { %2263 = vmatmul.mubr.msk.f32.vlgmr.msra.gmra.mrb[8].mxu0 %vm24_vm0, %v525_v18 }
 0x21a   :  { %2492 = vmatpush3.bf16.msra.mxu0 %v2718_v9  ;;  %2284 = vmatprep.mubr.msk.f32.mxu0 %vm2658_vm1, %v2659_v4 }
 0x21b   :  { %2493 = vmatprep.subr.bf16.mxu0 %v2657_v0 }
 0x21e   :  { %2495 = vmatpush3.bf16.msra.mxu0 %v2731_v13 }
 0x21f   :  { %2502 = vmatprep.subr.bf16.mxu0 %v2657_v0 }
 0x2e4   :  { %v595_v21 = vpop.f32.mrb[6].mxu0  ;;  %v665_v22 = vpop.f32.mrb[6].mxu1 }
 0x2e5   :  { %v741_v23 = vadd.f32 %v2001_v19, %v595_v21  ;;  %v2242_v25 = vpop.f32.mrb[7].mxu0  ;;  %v2253_v26 = vpop.f32.mrb[7].mxu1  ;;  %v750_v28 = vadd.f32 %v2003_v24, %v665_v22 }
 0x2e7   :  { %v2002_v27 = vmul.f32 -1.442695, %v741_v23  ;;  %v2004_v29 = vmul.f32 -1.442695, %v750_v28  ;;  %v2019_v23 = vld [vmem:[%s3000_s1 + $0x20] sm:$0xff] }
 0x2e9   :  { %2597 = vpow2.f32 %v2002_v27 }
 0x2ea   :  { %2599 = vpow2.f32 %v2004_v29 }
 0x2ec   :  { %v735_v30 = vpop.f32.mrb[8].mxu0 }
 0x2ed   :  { %v2264_v31 = vpop.f32.mrb[9].mxu0  ;;  %v736_v37 = vadd.f32 %v2784_v36, %v735_v30 }
 0x2f3   :  { %v2598_v32 = vpop.eup %2597 }
 0x2f4   :  { %v745_v33 = vadd.f32 1.0, %v2598_v32  ;;  %v2600_v34 = vpop.eup %2599 }
 0x2f5   :  { %v754_v35 = vadd.f32 1.0, %v2600_v34 }
 0x2f6   :  { %2601 = vrcp.f32 %v745_v33 }
 0x2f7   :  { %2603 = vrcp.f32 %v754_v35 }
 0x300   :  { %v2602_v38 = vpop.eup %2601 }
 0x301   :  { %v759_v40 = vmul.f32 %v2602_v38, %v736_v37  ;;  %v2604_v42 = vpop.eup %2603  ;;  %v2021_v38 = vld [vmem:[%s3002_s2 + $0x20] sm:$0xff] }
 0x302   :  { %v762_v43 = vsub.f32 1.0, %v2604_v42  ;;  %v764_v46 = vmul.f32 %v2604_v42, %v525_v18  ;;  %v2017_v18 = vld [vmem:[%s2999_s0 + $0x20] sm:$0xff] }
 0x303   :  { %v760_v41 = vadd.f32 %v2005_v39, %v759_v40 }
 0x305   :  { %2605 = vtanh.f32 %v760_v41 }
 0x30f   :  { %v2606_v44 = vpop.eup %2605 }
 0x310   :  { %v763_v45 = vmul.f32 %v2606_v44, %v762_v43 }
 0x312   :  { %v765_v47 = vadd.f32 %v764_v46, %v763_v45 }
 0x314   :  { %2274 = vmatmul.mubr.msk.f32.vlgmr.msra.gmra.mrb[8].mxu1 %vm24_vm0, %v765_v47  ;;  %2285 = vmatmul.mubr.msk.f32.vlgmr.msra.gmra.mrb[10].mxu0 %vm24_vm0, %v765_v47 }
 0x315   :  { %2498 = vmatpush3.bf16.msra.mxu1 %v2741_v17  ;;  %2295 = vmatprep.mubr.msk.f32.mxu1 %vm2658_vm1, %v2659_v4 }
 0x316   :  { %2499 = vmatprep.subr.bf16.mxu1 %v2657_v0  ;;  %2504 = vmatpush3.bf16.msra.mxu0 %v2704_v5 }
 0x317   :  { %2505 = vmatprep.subr.bf16.mxu0 %v2657_v0  ;;  %2306 = vmatprep.mubr.msk.f32.mxu0 %vm2658_vm1, %v2659_v4 }
 0x319   :  { %2501 = vmatpush3.bf16.msra.mxu1 %v2755_v20 }
 0x31a   :  { %2508 = vmatprep.subr.bf16.mxu1 %v2657_v0  ;;  %2507 = vmatpush3.bf16.msra.mxu0 %v2727_v12 }
 0x31b   :  { %2514 = vmatprep.subr.bf16.mxu0 %v2657_v0 }
 0x31c   :  { %2296 = vmatmul.mubr.msk.f32.vlgmr.msra.gmra.mrb[10].mxu1 %vm24_vm0, %v765_v47 }
 0x31d   :  { %2510 = vmatpush3.bf16.msra.mxu1 %v2718_v9  ;;  %2317 = vmatprep.mubr.msk.f32.mxu1 %vm2658_vm1, %v2659_v4 }
 0x31e   :  { %2511 = vmatprep.subr.bf16.mxu1 %v2657_v0 }
 0x321   :  { %2513 = vmatpush3.bf16.msra.mxu1 %v2731_v13 }
 0x322   :  { %2520 = vmatprep.subr.bf16.mxu1 %v2657_v0 }
 0x3e7   :  { %v835_v49 = vpop.f32.mrb[8].mxu1  ;;  %v905_v50 = vpop.f32.mrb[10].mxu0 }
 0x3e8   :  { %v981_v51 = vadd.f32 %v2009_v48, %v835_v49  ;;  %v2275_v53 = vpop.f32.mrb[9].mxu1  ;;  %v2286_v54 = vpop.f32.mrb[11].mxu0  ;;  %v990_v56 = vadd.f32 %v2011_v52, %v905_v50 }
 0x3ea   :  { %v2010_v55 = vmul.f32 -1.442695, %v981_v51  ;;  %v2012_v57 = vmul.f32 -1.442695, %v990_v56  ;;  %v2027_v51 = vld [vmem:[%s3000_s1 + $0x28] sm:$0xff] }
 0x3ec   :  { %2607 = vpow2.f32 %v2010_v55 }
 0x3ed   :  { %2609 = vpow2.f32 %v2012_v57 }
 0x3ef   :  { %v975_v58 = vpop.f32.mrb[10].mxu1 }
 0x3f0   :  { %v2297_v59 = vpop.f32.mrb[11].mxu1  ;;  %v976_v1 = vadd.f32 %v2784_v36, %v975_v58 }
 0x3f6   :  { %v2608_v60 = vpop.eup %2607 }
 0x3f7   :  { %v985_v61 = vadd.f32 1.0, %v2608_v60  ;;  %v2610_v62 = vpop.eup %2609 }
 0x3f8   :  { %v994_v63 = vadd.f32 1.0, %v2610_v62 }
 0x3f9   :  { %2611 = vrcp.f32 %v985_v61 }
 0x3fa   :  { %2613 = vrcp.f32 %v994_v63 }
 0x403   :  { %v2612_v2 = vpop.eup %2611 }
 0x404   :  { %v999_v6 = vmul.f32 %v2612_v2, %v976_v1  ;;  %v2614_v8 = vpop.eup %2613  ;;  %v2029_v2 = vld [vmem:[%s3002_s2 + $0x28] sm:$0xff] }
 0x405   :  { %v1002_v10 = vsub.f32 1.0, %v2614_v8  ;;  %v1004_v15 = vmul.f32 %v2614_v8, %v765_v47  ;;  %v2025_v47 = vld [vmem:[%s2999_s0 + $0x28] sm:$0xff] }
 0x406   :  { %v1000_v7 = vadd.f32 %v2013_v3, %v999_v6 }
 0x408   :  { %2615 = vtanh.f32 %v1000_v7 }
 0x412   :  { %v2616_v11 = vpop.eup %2615 }
 0x413   :  { %v1003_v14 = vmul.f32 %v2616_v11, %v1002_v10 }
 0x415   :  { %v1005_v16 = vadd.f32 %v1004_v15, %v1003_v14 }
 0x417   :  { %2307 = vmatmul.mubr.msk.f32.vlgmr.msra.gmra.mrb[12].mxu0 %vm24_vm0, %v1005_v16  ;;  %2318 = vmatmul.mubr.msk.f32.vlgmr.msra.gmra.mrb[12].mxu1 %vm24_vm0, %v1005_v16 }
 0x418   :  { %2516 = vmatpush3.bf16.msra.mxu0 %v2741_v17  ;;  %2328 = vmatprep.mubr.msk.f32.mxu0 %vm2658_vm1, %v2659_v4 }
 0x419   :  { %2517 = vmatprep.subr.bf16.mxu0 %v2657_v0  ;;  %2522 = vmatpush3.bf16.msra.mxu1 %v2704_v5 }
 0x41a   :  { %2523 = vmatprep.subr.bf16.mxu1 %v2657_v0  ;;  %2339 = vmatprep.mubr.msk.f32.mxu1 %vm2658_vm1, %v2659_v4 }
 0x41c   :  { %2519 = vmatpush3.bf16.msra.mxu0 %v2755_v20 }
 0x41d   :  { %2526 = vmatprep.subr.bf16.mxu0 %v2657_v0  ;;  %2525 = vmatpush3.bf16.msra.mxu1 %v2727_v12 }
 0x41e   :  { %2532 = vmatprep.subr.bf16.mxu1 %v2657_v0 }
 0x41f   :  { %2329 = vmatmul.mubr.msk.f32.vlgmr.msra.gmra.mrb[14].mxu0 %vm24_vm0, %v1005_v16 }
 0x420   :  { %2528 = vmatpush3.bf16.msra.mxu0 %v2718_v9  ;;  %2350 = vmatprep.mubr.msk.f32.mxu0 %vm2658_vm1, %v2659_v4 }
 0x421   :  { %2529 = vmatprep.subr.bf16.mxu0 %v2657_v0 }
 0x424   :  { %2531 = vmatpush3.bf16.msra.mxu0 %v2731_v13 }
 0x425   :  { %2538 = vmatprep.subr.bf16.mxu0 %v2657_v0 }
 0x4ea   :  { %v1075_v19 = vpop.f32.mrb[12].mxu0  ;;  %v1145_v21 = vpop.f32.mrb[12].mxu1 }
 0x4eb   :  { %v1221_v22 = vadd.f32 %v2017_v18, %v1075_v19  ;;  %v2308_v24 = vpop.f32.mrb[13].mxu0  ;;  %v2319_v25 = vpop.f32.mrb[13].mxu1  ;;  %v1230_v27 = vadd.f32 %v2019_v23, %v1145_v21  ;;  %v2035_v19 = vld [vmem:[%s3000_s1 + $0x30] sm:$0xff] }
 0x4ed   :  { %v2018_v26 = vmul.f32 -1.442695, %v1221_v22  ;;  %v2020_v28 = vmul.f32 -1.442695, %v1230_v27 }
 0x4ef   :  { %2617 = vpow2.f32 %v2018_v26 }
 0x4f0   :  { %2619 = vpow2.f32 %v2020_v28 }
 0x4f2   :  { %v1215_v29 = vpop.f32.mrb[14].mxu0 }
 0x4f3   :  { %v2330_v30 = vpop.f32.mrb[15].mxu0  ;;  %v1216_v35 = vadd.f32 %v2784_v36, %v1215_v29 }
 0x4f9   :  { %v2618_v31 = vpop.eup %2617 }
 0x4fa   :  { %v1225_v32 = vadd.f32 1.0, %v2618_v31  ;;  %v2620_v33 = vpop.eup %2619 }
 0x4fb   :  { %v1234_v34 = vadd.f32 1.0, %v2620_v33 }
 0x4fc   :  { %2621 = vrcp.f32 %v1225_v32  ;;  %v2037_v32 = vld [vmem:[%s3002_s2 + $0x30] sm:$0xff] }
 0x4fd   :  { %2623 = vrcp.f32 %v1234_v34 }
 0x506   :  { %v2622_v37 = vpop.eup %2621 }
 0x507   :  { %v1239_v39 = vmul.f32 %v2622_v37, %v1216_v35  ;;  %v2624_v41 = vpop.eup %2623 }
 0x508   :  { %v1242_v42 = vsub.f32 1.0, %v2624_v41  ;;  %v1244_v45 = vmul.f32 %v2624_v41, %v1005_v16 }
 0x509   :  { %v1240_v40 = vadd.f32 %v2021_v38, %v1239_v39 }
 0x50b   :  { %2625 = vtanh.f32 %v1240_v40 }
 0x515   :  { %v2626_v43 = vpop.eup %2625 }
 0x516   :  { %v1243_v44 = vmul.f32 %v2626_v43, %v1242_v42  ;;  %v2041_v42 = vld [vmem:[%s2999_s0 + $0x38] sm:$0xff] }
 0x518   :  { %v1245_v46 = vadd.f32 %v1244_v45, %v1243_v44 }
 0x51a   :  { %2340 = vmatmul.mubr.msk.f32.vlgmr.msra.gmra.mrb[14].mxu1 %vm24_vm0, %v1245_v46  ;;  %2351 = vmatmul.mubr.msk.f32.vlgmr.msra.gmra.mrb[16].mxu0 %vm24_vm0, %v1245_v46 }
 0x51b   :  { %2534 = vmatpush3.bf16.msra.mxu1 %v2741_v17  ;;  %2361 = vmatprep.mubr.msk.f32.mxu1 %vm2658_vm1, %v2659_v4 }
 0x51c   :  { %2535 = vmatprep.subr.bf16.mxu1 %v2657_v0  ;;  %2540 = vmatpush3.bf16.msra.mxu0 %v2704_v5 }
 0x51d   :  { %2541 = vmatprep.subr.bf16.mxu0 %v2657_v0  ;;  %2372 = vmatprep.mubr.msk.f32.mxu0 %vm2658_vm1, %v2659_v4 }
 0x51f   :  { %2537 = vmatpush3.bf16.msra.mxu1 %v2755_v20 }
 0x520   :  { %2544 = vmatprep.subr.bf16.mxu1 %v2657_v0  ;;  %2543 = vmatpush3.bf16.msra.mxu0 %v2727_v12 }
 0x521   :  { %2550 = vmatprep.subr.bf16.mxu0 %v2657_v0 }
 0x522   :  { %2362 = vmatmul.mubr.msk.f32.vlgmr.msra.gmra.mrb[16].mxu1 %vm24_vm0, %v1245_v46 }
 0x523   :  { %2546 = vmatpush3.bf16.msra.mxu1 %v2718_v9  ;;  %2383 = vmatprep.mubr.msk.f32.mxu1 %vm2658_vm1, %v2659_v4 }
 0x524   :  { %2547 = vmatprep.subr.bf16.mxu1 %v2657_v0 }
 0x527   :  { %2549 = vmatpush3.bf16.msra.mxu1 %v2731_v13 }
 0x528   :  { %2556 = vmatprep.subr.bf16.mxu1 %v2657_v0 }
 0x5ed   :  { %v1315_v48 = vpop.f32.mrb[14].mxu1  ;;  %v1385_v49 = vpop.f32.mrb[16].mxu0 }
 0x5ee   :  { %v1461_v50 = vadd.f32 %v2025_v47, %v1315_v48  ;;  %v2341_v52 = vpop.f32.mrb[15].mxu1  ;;  %v2352_v53 = vpop.f32.mrb[17].mxu0  ;;  %v1470_v55 = vadd.f32 %v2027_v51, %v1385_v49 }
 0x5f0   :  { %v2026_v54 = vmul.f32 -1.442695, %v1461_v50  ;;  %v2028_v56 = vmul.f32 -1.442695, %v1470_v55 }
 0x5f2   :  { %2627 = vpow2.f32 %v2026_v54 }
 0x5f3   :  { %2629 = vpow2.f32 %v2028_v56  ;;  %v2045_v56 = vld [vmem:[%s3002_s2 + $0x38] sm:$0xff] }
 0x5f5   :  { %v1455_v57 = vpop.f32.mrb[16].mxu1 }
 0x5f6   :  { %v2363_v58 = vpop.f32.mrb[17].mxu1  ;;  %v1456_v63 = vadd.f32 %v2784_v36, %v1455_v57 }
 0x5fc   :  { %v2628_v59 = vpop.eup %2627 }
 0x5fd   :  { %v1465_v60 = vadd.f32 1.0, %v2628_v59  ;;  %v2630_v61 = vpop.eup %2629 }
 0x5fe   :  { %v1474_v62 = vadd.f32 1.0, %v2630_v61 }
 0x5ff   :  { %2631 = vrcp.f32 %v1465_v60 }
 0x600   :  { %2633 = vrcp.f32 %v1474_v62 }
 0x609   :  { %v2632_v1 = vpop.eup %2631 }
 0x60a   :  { %v1479_v3 = vmul.f32 %v2632_v1, %v1456_v63  ;;  %v2634_v7 = vpop.eup %2633 }
 0x60b   :  { %v1482_v8 = vsub.f32 1.0, %v2634_v7  ;;  %v1484_v14 = vmul.f32 %v2634_v7, %v1245_v46 }
 0x60c   :  { %v1480_v6 = vadd.f32 %v2029_v2, %v1479_v3 }
 0x60e   :  { %2635 = vtanh.f32 %v1480_v6 }
 0x618   :  { %v2636_v10 = vpop.eup %2635 }
 0x619   :  { %v1483_v11 = vmul.f32 %v2636_v10, %v1482_v8 }
 0x61b   :  { %v1485_v15 = vadd.f32 %v1484_v14, %v1483_v11 }
 0x61d   :  { %2373 = vmatmul.mubr.msk.f32.vlgmr.msra.gmra.mrb[18].mxu0 %vm24_vm0, %v1485_v15  ;;  %2384 = vmatmul.mubr.msk.f32.vlgmr.msra.gmra.mrb[18].mxu1 %vm24_vm0, %v1485_v15 }
 0x61e   :  { %2552 = vmatpush3.bf16.msra.mxu0 %v2741_v17  ;;  %2394 = vmatprep.mubr.msk.f32.mxu0 %vm2658_vm1, %v2659_v4 }
 0x61f   :  { %2553 = vmatprep.subr.bf16.mxu0 %v2657_v0  ;;  %2558 = vmatpush3.bf16.msra.mxu1 %v2704_v5  ;;  %v2033_v5 = vld [vmem:[%s2999_s0 + $0x30] sm:$0xff] }
 0x620   :  { %2559 = vmatprep.subr.bf16.mxu1 %v2657_v0  ;;  %2405 = vmatprep.mubr.msk.f32.mxu1 %vm2658_vm1, %v2659_v4 }
 0x622   :  { %2555 = vmatpush3.bf16.msra.mxu0 %v2755_v20 }
 0x623   :  { %2562 = vmatprep.subr.bf16.mxu0 %v2657_v0  ;;  %2561 = vmatpush3.bf16.msra.mxu1 %v2727_v12 }
 0x624   :  { %2568 = vmatprep.subr.bf16.mxu1 %v2657_v0 }
 0x625   :  { %2395 = vmatmul.mubr.msk.f32.vlgmr.msra.gmra.mrb[20].mxu0 %vm24_vm0, %v1485_v15 }
 0x626   :  { %2564 = vmatpush3.bf16.msra.mxu0 %v2718_v9  ;;  %2416 = vmatprep.mubr.msk.f32.mxu0 %vm2658_vm1, %v2659_v4 }
 0x627   :  { %2565 = vmatprep.subr.bf16.mxu0 %v2657_v0 }
 0x62a   :  { %2567 = vmatpush3.bf16.msra.mxu0 %v2731_v13 }
 0x6f0   :  { %v1555_v16 = vpop.f32.mrb[18].mxu0  ;;  %v1625_v18 = vpop.f32.mrb[18].mxu1 }
 0x6f1   :  { %v1701_v12 = vadd.f32 %v2033_v5, %v1555_v16  ;;  %v2374_v21 = vpop.f32.mrb[19].mxu0  ;;  %v2385_v9 = vpop.f32.mrb[19].mxu1  ;;  %v1710_v23 = vadd.f32 %v2035_v19, %v1625_v18 }
 0x6f3   :  { %v2034_v22 = vmul.f32 -1.442695, %v1701_v12  ;;  %v2036_v24 = vmul.f32 -1.442695, %v1710_v23 }
 0x6f5   :  { %2637 = vpow2.f32 %v2034_v22 }
 0x6f6   :  { %2639 = vpow2.f32 %v2036_v24 }
 0x6f8   :  { %v1695_v25 = vpop.f32.mrb[20].mxu0 }
 0x6f9   :  { %v2396_v26 = vpop.f32.mrb[21].mxu0  ;;  %v1696_v30 = vadd.f32 %v2784_v36, %v1695_v25 }
 0x6ff   :  { %v2638_v13 = vpop.eup %2637 }
 0x700   :  { %v1705_v27 = vadd.f32 1.0, %v2638_v13  ;;  %v2640_v28 = vpop.eup %2639 }
 0x701   :  { %v1714_v29 = vadd.f32 1.0, %v2640_v28 }
 0x702   :  { %2641 = vrcp.f32 %v1705_v27 }
 0x703   :  { %2643 = vrcp.f32 %v1714_v29 }
 0x70c   :  { %v2642_v31 = vpop.eup %2641 }
 0x70d   :  { %v1719_v33 = vmul.f32 %v2642_v31, %v1696_v30  ;;  %v2644_v35 = vpop.eup %2643 }
 0x70e   :  { %v1722_v37 = vsub.f32 1.0, %v2644_v35  ;;  %v1724_v40 = vmul.f32 %v2644_v35, %v1485_v15 }
 0x70f   :  { %v1720_v34 = vadd.f32 %v2037_v32, %v1719_v33 }
 0x711   :  { %2645 = vtanh.f32 %v1720_v34 }
 0x71b   :  { %v2646_v38 = vpop.eup %2645 }
 0x71c   :  { %v1723_v39 = vmul.f32 %v2646_v38, %v1722_v37 }
 0x71e   :  { %v1725_v41 = vadd.f32 %v1724_v40, %v1723_v39 }
 0x720   :  { %2406 = vmatmul.mubr.msk.f32.vlgmr.msra.gmra.mrb[20].mxu1 %vm24_vm0, %v1725_v41  ;;  %2417 = vmatmul.mubr.msk.f32.vlgmr.msra.gmra.mrb[22].mxu0 %vm24_vm0, %v1725_v41 }
 0x721   :  { %2570 = vmatpush3.bf16.msra.mxu1 %v2741_v17  ;;  %2427 = vmatprep.mubr.msk.f32.mxu1 %vm2658_vm1, %v2659_v4  ;;  %v2043_v17 = vld [vmem:[%s3000_s1 + $0x38] sm:$0xff] }
 0x722   :  { %2571 = vmatprep.subr.bf16.mxu1 %v2657_v0 }
 0x725   :  { %2573 = vmatpush3.bf16.msra.mxu1 %v2755_v20 }
 0x728   :  { %2428 = vmatmul.mubr.msk.f32.vlgmr.msra.gmra.mrb[22].mxu1 %vm24_vm0, %v1725_v41 }
 0x7f3   :  { %v1795_v43 = vpop.f32.mrb[20].mxu1  ;;  %v1865_v44 = vpop.f32.mrb[22].mxu0 }
 0x7f4   :  { %v1941_v45 = vadd.f32 %v2041_v42, %v1795_v43  ;;  %v2407_v46 = vpop.f32.mrb[21].mxu1  ;;  %v2418_v47 = vpop.f32.mrb[23].mxu0  ;;  %v1950_v48 = vadd.f32 %v2043_v17, %v1865_v44 }
 0x7f6   :  { %v2042_v4 = vmul.f32 -1.442695, %v1941_v45  ;;  %v2044_v0 = vmul.f32 -1.442695, %v1950_v48 }
 0x7f8   :  { %2647 = vpow2.f32 %v2042_v4 }
 0x7f9   :  { %2649 = vpow2.f32 %v2044_v0 }
 0x7fb   :  { %v1935_v20 = vpop.f32.mrb[22].mxu1 }
 0x7fc   :  { %v2429_v49 = vpop.f32.mrb[23].mxu1  ;;  %v1936_v54 = vadd.f32 %v2784_v36, %v1935_v20 }
 0x802   :  { %v2648_v50 = vpop.eup %2647 }
 0x803   :  { %v1945_v51 = vadd.f32 1.0, %v2648_v50  ;;  %v2650_v52 = vpop.eup %2649 }
 0x804   :  { %v1954_v53 = vadd.f32 1.0, %v2650_v52 }
 0x805   :  { %2651 = vrcp.f32 %v1945_v51 }
 0x806   :  { %2653 = vrcp.f32 %v1954_v53 }
 0x80f   :  { %v2652_v55 = vpop.eup %2651 }
 0x810   :  { %v1959_v57 = vmul.f32 %v2652_v55, %v1936_v54  ;;  %v2654_v59 = vpop.eup %2653 }
 0x811   :  { %v1962_v60 = vsub.f32 1.0, %v2654_v59  ;;  %v1964_v62 = vmul.f32 %v2654_v59, %v1725_v41 }
 0x812   :  { %v1960_v58 = vadd.f32 %v2045_v56, %v1959_v57 }
 0x814   :  { %2655 = vtanh.f32 %v1960_v58 }
 0x81e   :  { %v2656_v61 = vpop.eup %2655 }
 0x81f   :  { %v1963_v63 = vmul.f32 %v2656_v61, %v1962_v60 }
 0x821   :  { %v1965_v1 = vadd.f32 %v1964_v62, %v1963_v63 }
 0x823   :  { %1966 = vst.msk [vmem:[#allocation2] sm:$0xff] %vm24_vm0, %v1965_v1 }
 0x82a   :  { %v1970_v2 = vld [vmem:[#allocation2] sm:$0xff] }
 0x82b   :  { %1971 = vst.msk [vmem:[%s3003_s5] sm:$0xff] %vm24_vm0, %v1970_v2 }

</bundles_post_ra>
